<compile_context>
chip_gen: v5e
topology: v5e:2x2
jax: 0.10.0
libtpu: 0.0.40
codegen_flags: <defaults>
</compile_context>

<pallas_src>
import math
import numpy as np
import jax
import jax.numpy as jnp
from jax.experimental import pallas as pl
from jax.experimental.pallas import tpu as pltpu

EMBED_DIM = 32
N_HEADS = 4
HEAD_DIM = EMBED_DIM // N_HEADS
FFN_DIM = 4 * EMBED_DIM
LN_EPS = 1e-5
CONST_W = 4 * EMBED_DIM          # 128-lane width of the packed bias/LN slab
MM_DTYPE = jnp.bfloat16          # matmul operand dtype (f32 accumulation)

# Row indices inside the packed bias / LayerNorm constant slab.
R_BQKV1, R_BO1, R_BQ2, R_BKV2, R_BO2, R_BF1, R_BF2 = 0, 1, 2, 3, 4, 5, 6
R_LN1G, R_LN1B, R_LN2G, R_LN2B, R_LN3G, R_LN3B = 7, 8, 9, 10, 11, 12
N_CONST_ROWS = 13


# ---- in-kernel helpers -------------------------------------------------------
def _layernorm(x, gamma, beta):
    mu = jnp.mean(x, axis=-1, keepdims=True)
    xc = x - mu
    var = jnp.mean(xc * xc, axis=-1, keepdims=True)
    return xc * jax.lax.rsqrt(var + LN_EPS) * gamma + beta


def _gelu_tanh(x):
    c = 0.7978845608028654  # sqrt(2/pi)
    return 0.5 * x * (1.0 + jnp.tanh(c * (x + 0.044715 * x * x * x)))


def _mh_attention(q3, k3, v3, wo_ref):
    """Multi-head attention fused with the output projection.

    q3: (Bb, Lq, E) f32 with 1/sqrt(Dh) already folded into the Q projection,
    k3/v3: (Bb, Lk, E) f32, wo_ref: (E, E) bf16 VMEM ref.
    Returns sum_h softmax(q_h k_h^T) v_h @ Wo[h*Dh:(h+1)*Dh, :] as a flat
    (Bb*Lq, E) f32 slab — each head is accumulated straight through its Wo
    slice, so there is no per-head lane concat.
    """
    bb, lq, _ = q3.shape
    out = None
    for h in range(N_HEADS):                              # static loop, H = 4
        lo = h * HEAD_DIM
        qh = q3[:, :, lo:lo + HEAD_DIM]
        kh = k3[:, :, lo:lo + HEAD_DIM]
        vh = v3[:, :, lo:lo + HEAD_DIM]
        s = jnp.einsum('bqd,bkd->bqk', qh, kh,
                       preferred_element_type=jnp.float32)        # (Bb,Lq,Lk)
        p = jnp.exp(s - jnp.max(s, axis=-1, keepdims=True))
        l = jnp.sum(p, axis=-1, keepdims=True)                    # (Bb,Lq,1)
        o = jnp.einsum('bqk,bkd->bqd', p, vh,
                       preferred_element_type=jnp.float32)        # (Bb,Lq,Dh)
        # deferred softmax normalization on the small (Lq, Dh) output
        o = o * pl.reciprocal(l, approx=True)
        o2 = o.reshape(bb * lq, HEAD_DIM)
        contrib = jnp.dot(o2.astype(MM_DTYPE), wo_ref[lo:lo + HEAD_DIM, :],
                          preferred_element_type=jnp.float32)     # (Bb*Lq, E)
        out = contrib if out is None else out + contrib
    return out


# ---- fused Pallas kernel: whole CrossAttnLayer for one batch block -----------
def cross_attn_kernel(close_ref, dist_ref, consts_ref,
                      wqkv1_ref, wo1_ref, wq2_ref, wkv2_ref, wo2_ref,
                      wf1_ref, wf2_ref, out_ref):
    e = EMBED_DIM
    bb, lq, _ = dist_ref.shape
    lk = close_ref.shape[1]

    def bias(row, width):                       # (1, width) f32 from the slab
        return consts_ref[row:row + 1, :width]

    def ln(x, grow, brow):
        return _layernorm(x, bias(grow, e), bias(brow, e))

    dist2d = dist_ref[...].reshape(bb * lq, e)                    # (Bb*Lq, E)
    close2d = close_ref[...].reshape(bb * lk, e)                  # (Bb*Lk, E)

    # ---- block 1: self-attention over `dist` + LayerNorm + residual --------
    qkv = jnp.dot(dist2d.astype(MM_DTYPE), wqkv1_ref[...],
                  preferred_element_type=jnp.float32) + bias(R_BQKV1, 3 * e)
    qkv3 = qkv.reshape(bb, lq, 3 * e)
    a1 = _mh_attention(qkv3[:, :, :e], qkv3[:, :, e:2 * e], qkv3[:, :, 2 * e:],
                       wo1_ref) + bias(R_BO1, e)
    x1 = ln(a1, R_LN1G, R_LN1B) + dist2d

    # ---- block 2: cross-attention (query = x1, key/value = close) ----------
    q2 = jnp.dot(x1.astype(MM_DTYPE), wq2_ref[...],
                 preferred_element_type=jnp.float32) + bias(R_BQ2, e)
    kv2 = jnp.dot(close2d.astype(MM_DTYPE), wkv2_ref[...],
                  preferred_element_type=jnp.float32) + bias(R_BKV2, 2 * e)
    kv23 = kv2.reshape(bb, lk, 2 * e)
    a2 = _mh_attention(q2.reshape(bb, lq, e), kv23[:, :, :e], kv23[:, :, e:],
                       wo2_ref) + bias(R_BO2, e)
    x2 = ln(a2, R_LN2G, R_LN2B) + x1

    # ---- block 3: FFN (Linear -> GELU -> Linear) + LayerNorm + residual ----
    hdn = jnp.dot(x2.astype(MM_DTYPE), wf1_ref[...],
                  preferred_element_type=jnp.float32) + bias(R_BF1, FFN_DIM)
    hdn = _gelu_tanh(hdn)
    f = jnp.dot(hdn.astype(MM_DTYPE), wf2_ref[...],
                preferred_element_type=jnp.float32) + bias(R_BF2, e)
    y = ln(f, R_LN3G, R_LN3B) + x2
    out_ref[...] = y.reshape(bb, lq, e).astype(out_ref.dtype)


# ---- wrapper-side parameter prep ---------------------------------------------
def _pick_batch_block(batch):
    """Largest divisor of `batch` that is <= 8.

    Whole-batch blocks at small B minimize per-grid-step overhead; for larger B
    this yields >= 2 grid steps so megacore (v7x) can shard the batch axis, and
    keeps per-step VMEM small on v7x's 64 MiB.
    """
    bb = min(batch, 8)
    while batch % bb:
        bb -= 1
    return bb


def _prep_params(params):
    """Fold softmax scale into Q, cast weights to bf16, pack biases/LN slab."""
    (wqkv1, bqkv1, wo1, bo1, ln1,
     wq2, bq2, wkv2, bkv2, wo2, bo2, ln2,
     wf1, bf1, wf2, bf2, ln3) = params
    e = EMBED_DIM
    scale = 1.0 / math.sqrt(HEAD_DIM)

    # fold 1/sqrt(Dh) into the Q projections (weight AND bias)
    wqkv1 = jnp.concatenate([wqkv1[:, :e] * scale, wqkv1[:, e:]], axis=1)
    bqkv1 = jnp.concatenate([bqkv1[:, :e] * scale, bqkv1[:, e:]], axis=1)
    wq2 = wq2 * scale
    bq2 = bq2 * scale

    def row(vec):                                   # (1, w) -> (1, CONST_W)
        return jnp.pad(vec, ((0, 0), (0, CONST_W - vec.shape[1])))

    consts = jnp.concatenate([
        row(bqkv1), row(bo1), row(bq2), row(bkv2), row(bo2), row(bf1), row(bf2),
        row(ln1[0:1]), row(ln1[1:2]),
        row(ln2[0:1]), row(ln2[1:2]),
        row(ln3[0:1]), row(ln3[1:2]),
    ], axis=0).astype(jnp.float32)                  # (13, 128)

    weights = tuple(w.astype(MM_DTYPE)
                    for w in (wqkv1, wo1, wq2, wkv2, wo2, wf1, wf2))
    return consts, weights


def cross_attn_forward(close, dist, params):
    B, Lk, E = close.shape
    _, Lq, _ = dist.shape
    consts, weights = _prep_params(params)
    bblk = _pick_batch_block(B)

    def const_spec(arr):
        zeros = (0,) * arr.ndim
        return pl.BlockSpec(arr.shape, lambda b: zeros)   # resident across grid

    grid_spec = pltpu.PrefetchScalarGridSpec(
        num_scalar_prefetch=0,
        grid=(B // bblk,),
        in_specs=[
            pl.BlockSpec((bblk, Lk, E), lambda b: (b, 0, 0)),   # close
            pl.BlockSpec((bblk, Lq, E), lambda b: (b, 0, 0)),   # dist
            const_spec(consts),
            *[const_spec(w) for w in weights],
        ],
        out_specs=pl.BlockSpec((bblk, Lq, E), lambda b: (b, 0, 0)),
    )

    flops = 2 * B * (
        Lq * E * (3 * E)            # QKV projection (block 1)
        + Lq * E * E                # output projection (block 1)
        + Lq * E * E                # Q projection (block 2)
        + Lk * E * (2 * E)          # KV projection (block 2)
        + Lq * E * E                # output projection (block 2)
        + Lq * E * FFN_DIM          # FFN up
        + Lq * FFN_DIM * E          # FFN down
        + 2 * 2 * Lq * Lk * E)      # scores + PV, both attention blocks
    transcendentals = B * (2 * N_HEADS * Lq * Lk + Lq * FFN_DIM)
    bytes_accessed = (int(close.size) + int(dist.size) + B * Lq * E) * 4 \
        + sum(int(w.size) for w in weights) * 2 + int(consts.size) * 4
    cost = pl.CostEstimate(flops=flops, transcendentals=transcendentals,
                           bytes_accessed=bytes_accessed)

    return pl.pallas_call(
        cross_attn_kernel,
        out_shape=jax.ShapeDtypeStruct((B, Lq, E), jnp.float32),
        grid_spec=grid_spec,
        compiler_params=pltpu.CompilerParams(
            dimension_semantics=("parallel",),
            vmem_limit_bytes=32 * 1024 * 1024),
        cost_estimate=cost,
    )(close, dist, consts, *weights)


# ---- pure-JAX reference (independent implementation, mirrors torch) ----------
def cross_attn_reference(close, dist, params):
    (wqkv1, bqkv1, wo1, bo1, ln1,
     wq2, bq2, wkv2, bkv2, wo2, bo2, ln2,
     wf1, bf1, wf2, bf2, ln3) = params
    E, H = EMBED_DIM, N_HEADS
    Dh = E // H
    hp = jax.lax.Precision.HIGHEST

    def mha(q_in, k_in, v_in, wq, bq, wk, bk, wv, bv, wo, bo):
        q = jnp.einsum('ble,ef->blf', q_in, wq, precision=hp) + bq
        k = jnp.einsum('ble,ef->blf', k_in, wk, precision=hp) + bk
        v = jnp.einsum('ble,ef->blf', v_in, wv, precision=hp) + bv
        B, Lq, _ = q.shape
        Lk = k.shape[1]
        qh = q.reshape(B, Lq, H, Dh).transpose(0, 2, 1, 3)
        kh = k.reshape(B, Lk, H, Dh).transpose(0, 2, 1, 3)
        vh = v.reshape(B, Lk, H, Dh).transpose(0, 2, 1, 3)
        s = jnp.einsum('bhqd,bhkd->bhqk', qh, kh, precision=hp) / math.sqrt(Dh)
        p = jax.nn.softmax(s, axis=-1)
        o = jnp.einsum('bhqk,bhkd->bhqd', p, vh, precision=hp)
        o = o.transpose(0, 2, 1, 3).reshape(B, Lq, E)
        return jnp.einsum('ble,ef->blf', o, wo, precision=hp) + bo

    def layernorm(x, g, b):
        mu = x.mean(-1, keepdims=True)
        var = ((x - mu) ** 2).mean(-1, keepdims=True)
        return (x - mu) / jnp.sqrt(var + LN_EPS) * g + b

    def gelu(x):
        c = math.sqrt(2.0 / math.pi)
        return 0.5 * x * (1.0 + jnp.tanh(c * (x + 0.044715 * x ** 3)))

    wq1, wk1, wv1 = wqkv1[:, :E], wqkv1[:, E:2 * E], wqkv1[:, 2 * E:]
    bq1, bk1, bv1 = bqkv1[:, :E], bqkv1[:, E:2 * E], bqkv1[:, 2 * E:]
    wk2, wv2 = wkv2[:, :E], wkv2[:, E:]
    bk2, bv2 = bkv2[:, :E], bkv2[:, E:]

    x1 = layernorm(mha(dist, dist, dist, wq1, bq1, wk1, bk1, wv1, bv1, wo1, bo1),
                   ln1[0], ln1[1]) + dist
    x2 = layernorm(mha(x1, close, close, wq2, bq2, wk2, bk2, wv2, bv2, wo2, bo2),
                   ln2[0], ln2[1]) + x1
    h = gelu(jnp.einsum('ble,ef->blf', x2, wf1, precision=hp) + bf1)
    f = jnp.einsum('blf,fe->ble', h, wf2, precision=hp) + bf2
    return layernorm(f, ln3[0], ln3[1]) + x2


# ---- deterministic parameter init --------------------------------------------
def init_params(key):
    e, f = EMBED_DIM, FFN_DIM
    ks = list(jax.random.split(key, 20))

    def w(k, shape, scale=0.1):
        return scale * jax.random.normal(k, shape, jnp.float32)

    def ln(kg, kb):
        return jnp.stack([1.0 + 0.1 * jax.random.normal(kg, (e,), jnp.float32),
                          0.1 * jax.random.normal(kb, (e,), jnp.float32)])

    wqkv1, bqkv1 = w(ks[0], (e, 3 * e)), w(ks[1], (1, 3 * e))
    wo1, bo1 = w(ks[2], (e, e)), w(ks[3], (1, e))
    ln1 = ln(ks[4], ks[5])
    wq2, bq2 = w(ks[6], (e, e)), w(ks[7], (1, e))
    wkv2, bkv2 = w(ks[8], (e, 2 * e)), w(ks[9], (1, 2 * e))
    wo2, bo2 = w(ks[10], (e, e)), w(ks[11], (1, e))
    ln2 = ln(ks[12], ks[13])
    wf1, bf1 = w(ks[14], (e, f)), w(ks[15], (1, f))
    wf2, bf2 = w(ks[16], (f, e)), w(ks[17], (1, e))
    ln3 = ln(ks[18], ks[19])
    return (wqkv1, bqkv1, wo1, bo1, ln1,
            wq2, bq2, wkv2, bkv2, wo2, bo2, ln2,
            wf1, bf1, wf2, bf2, ln3)


if __name__ == "__main__":
    key = jax.random.PRNGKey(0)
    kc, kd, kp = jax.random.split(key, 3)

    B, L_CLOSE, L_DIST = 2, 16, 8
    close = jax.random.normal(kc, (B, L_CLOSE, EMBED_DIM), jnp.float32)
    dist = jax.random.normal(kd, (B, L_DIST, EMBED_DIM), jnp.float32)
    params = init_params(kp)

    out = jax.block_until_ready(cross_attn_forward(close, dist, params))
    assert out.shape == (B, L_DIST, EMBED_DIM) and out.dtype == jnp.float32

    ref = cross_attn_reference(close, dist, params)
    # bf16 matmul operands (f32 accumulation) + approx softmax reciprocal shift
    # results by up to ~1e-2 vs the all-f32 reference; 2e-2 absorbs that.
    np.testing.assert_allclose(np.asarray(out), np.asarray(ref),
                               rtol=2e-2, atol=2e-2)
    print("KERNEL_OK")
</pallas_src>

<mosaic_0001>
module attributes {stable_mosaic.version = 11 : i64} {
  func.func @cross_attn_kernel(%arg0: i32, %arg1: memref<2x16x32xf32, #tpu.memory_space<vmem>>, %arg2: memref<2x8x32xf32, #tpu.memory_space<vmem>>, %arg3: memref<13x128xf32, #tpu.memory_space<vmem>>, %arg4: memref<32x96xbf16, #tpu.memory_space<vmem>>, %arg5: memref<32x32xbf16, #tpu.memory_space<vmem>>, %arg6: memref<32x32xbf16, #tpu.memory_space<vmem>>, %arg7: memref<32x64xbf16, #tpu.memory_space<vmem>>, %arg8: memref<32x32xbf16, #tpu.memory_space<vmem>>, %arg9: memref<32x128xbf16, #tpu.memory_space<vmem>>, %arg10: memref<128x32xbf16, #tpu.memory_space<vmem>>, %arg11: memref<2x8x32xf32, #tpu.memory_space<vmem>>) attributes {dimension_semantics = [#tpu.dimension_semantics<parallel>], iteration_bounds = array<i64: 1>, scalar_prefetch = 0 : i64, scratch_operands = 0 : i64, tpu.core_type = #tpu.core_type<tc>, window_params = [{transform_indices = @transform_0, window_bounds = array<i64: 2, 16, 32>}, {transform_indices = @transform_1, window_bounds = array<i64: 2, 8, 32>}, {pipeline_mode = #tpu.pipeline_mode<synchronous>, transform_indices = @transform_2, window_bounds = array<i64: 13, 128>}, {pipeline_mode = #tpu.pipeline_mode<synchronous>, transform_indices = @transform_3, window_bounds = array<i64: 32, 96>}, {pipeline_mode = #tpu.pipeline_mode<synchronous>, transform_indices = @transform_4, window_bounds = array<i64: 32, 32>}, {pipeline_mode = #tpu.pipeline_mode<synchronous>, transform_indices = @transform_5, window_bounds = array<i64: 32, 32>}, {pipeline_mode = #tpu.pipeline_mode<synchronous>, transform_indices = @transform_6, window_bounds = array<i64: 32, 64>}, {pipeline_mode = #tpu.pipeline_mode<synchronous>, transform_indices = @transform_7, window_bounds = array<i64: 32, 32>}, {pipeline_mode = #tpu.pipeline_mode<synchronous>, transform_indices = @transform_8, window_bounds = array<i64: 32, 128>}, {pipeline_mode = #tpu.pipeline_mode<synchronous>, transform_indices = @transform_9, window_bounds = array<i64: 128, 32>}, {transform_indices = @transform_10, window_bounds = array<i64: 2, 8, 32>}]} {
    %c0 = arith.constant 0 : index
    %c0_0 = arith.constant 0 : index
    %c0_1 = arith.constant 0 : index
    %0 = vector.load %arg2[%c0, %c0_0, %c0_1] : memref<2x8x32xf32, #tpu.memory_space<vmem>>, vector<2x8x32xf32>
    %1 = vector.shape_cast %0 : vector<2x8x32xf32> to vector<16x32xf32>
    %c0_2 = arith.constant 0 : index
    %c0_3 = arith.constant 0 : index
    %c0_4 = arith.constant 0 : index
    %2 = vector.load %arg1[%c0_2, %c0_3, %c0_4] : memref<2x16x32xf32, #tpu.memory_space<vmem>>, vector<2x16x32xf32>
    %3 = vector.shape_cast %2 : vector<2x16x32xf32> to vector<32x32xf32>
    %4 = arith.truncf %1 : vector<16x32xf32> to vector<16x32xbf16>
    %c0_5 = arith.constant 0 : index
    %c0_6 = arith.constant 0 : index
    %5 = vector.load %arg4[%c0_5, %c0_6] : memref<32x96xbf16, #tpu.memory_space<vmem>>, vector<32x96xbf16>
    %cst = arith.constant dense<0.000000e+00> : vector<16x96xf32>
    %6 = tpu.matmul %4, %5, %cst {dimension_numbers = #tpu.dot_dimension_numbers<[1], [0], [0], [1], [0, 0, 1, 1], [], []>} : vector<16x32xbf16>, vector<32x96xbf16>, vector<16x96xf32> -> vector<16x96xf32>
    %c0_7 = arith.constant 0 : index
    %c0_8 = arith.constant 0 : index
    %7 = vector.load %arg3[%c0_7, %c0_8] : memref<13x128xf32, #tpu.memory_space<vmem>>, vector<1x96xf32>
    %8 = vector.broadcast %7 : vector<1x96xf32> to vector<16x96xf32>
    %9 = arith.addf %6, %8 : vector<16x96xf32>
    %10 = vector.shape_cast %9 : vector<16x96xf32> to vector<2x8x96xf32>
    %11 = vector.extract_strided_slice %10 {offsets = [0, 0, 0], sizes = [2, 8, 32], strides = [1, 1, 1]} : vector<2x8x96xf32> to vector<2x8x32xf32>
    %12 = vector.extract_strided_slice %10 {offsets = [0, 0, 32], sizes = [2, 8, 32], strides = [1, 1, 1]} : vector<2x8x96xf32> to vector<2x8x32xf32>
    %13 = vector.extract_strided_slice %10 {offsets = [0, 0, 64], sizes = [2, 8, 32], strides = [1, 1, 1]} : vector<2x8x96xf32> to vector<2x8x32xf32>
    %14 = vector.extract_strided_slice %11 {offsets = [0, 0, 0], sizes = [2, 8, 8], strides = [1, 1, 1]} : vector<2x8x32xf32> to vector<2x8x8xf32>
    %15 = vector.extract_strided_slice %12 {offsets = [0, 0, 0], sizes = [2, 8, 8], strides = [1, 1, 1]} : vector<2x8x32xf32> to vector<2x8x8xf32>
    %16 = vector.extract_strided_slice %13 {offsets = [0, 0, 0], sizes = [2, 8, 8], strides = [1, 1, 1]} : vector<2x8x32xf32> to vector<2x8x8xf32>
    "tpu.trace_start"() <{level = 10 : i32, message = "bqd,bkd->bqk"}> : () -> ()
    %cst_9 = arith.constant dense<0.000000e+00> : vector<2x8x8xf32>
    %17 = tpu.matmul %14, %15, %cst_9 {dimension_numbers = #tpu.dot_dimension_numbers<[2], [2], [1], [1], [0, 0, 0, 1, 1, 1], [0], [0]>} : vector<2x8x8xf32>, vector<2x8x8xf32>, vector<2x8x8xf32> -> vector<2x8x8xf32>
    "tpu.trace_stop"() : () -> ()
    %cst_10 = arith.constant dense<0xFF800000> : vector<2x8xf32>
    %18 = vector.multi_reduction <maximumf>, %17, %cst_10 [2] : vector<2x8x8xf32> to vector<2x8xf32>
    %19 = vector.shape_cast %18 : vector<2x8xf32> to vector<2x8x1xf32>
    %20 = vector.broadcast %19 : vector<2x8x1xf32> to vector<2x8x8xf32>
    %21 = arith.subf %17, %20 : vector<2x8x8xf32>
    %22 = math.exp %21 : vector<2x8x8xf32>
    %cst_11 = arith.constant dense<0.000000e+00> : vector<2x8xf32>
    %23 = vector.multi_reduction <add>, %22, %cst_11 [2] : vector<2x8x8xf32> to vector<2x8xf32>
    %24 = vector.shape_cast %23 : vector<2x8xf32> to vector<2x8x1xf32>
    "tpu.trace_start"() <{level = 10 : i32, message = "bqk,bkd->bqd"}> : () -> ()
    %cst_12 = arith.constant dense<0.000000e+00> : vector<2x8x8xf32>
    %25 = tpu.matmul %22, %16, %cst_12 {dimension_numbers = #tpu.dot_dimension_numbers<[2], [1], [1], [2], [0, 0, 0, 1, 1, 2], [0], [0]>} : vector<2x8x8xf32>, vector<2x8x8xf32>, vector<2x8x8xf32> -> vector<2x8x8xf32>
    "tpu.trace_stop"() : () -> ()
    %26 = tpu.reciprocal %24 {approx = true} : vector<2x8x1xf32> -> vector<2x8x1xf32>
    %27 = vector.broadcast %26 : vector<2x8x1xf32> to vector<2x8x8xf32>
    %28 = arith.mulf %25, %27 : vector<2x8x8xf32>
    %29 = vector.shape_cast %28 : vector<2x8x8xf32> to vector<16x8xf32>
    %30 = arith.truncf %29 : vector<16x8xf32> to vector<16x8xbf16>
    %c0_13 = arith.constant 0 : index
    %c0_14 = arith.constant 0 : index
    %31 = vector.load %arg5[%c0_13, %c0_14] : memref<32x32xbf16, #tpu.memory_space<vmem>>, vector<8x32xbf16>
    %cst_15 = arith.constant dense<0.000000e+00> : vector<16x32xf32>
    %32 = tpu.matmul %30, %31, %cst_15 {dimension_numbers = #tpu.dot_dimension_numbers<[1], [0], [0], [1], [0, 0, 1, 1], [], []>} : vector<16x8xbf16>, vector<8x32xbf16>, vector<16x32xf32> -> vector<16x32xf32>
    %33 = vector.extract_strided_slice %11 {offsets = [0, 0, 8], sizes = [2, 8, 8], strides = [1, 1, 1]} : vector<2x8x32xf32> to vector<2x8x8xf32>
    %34 = vector.extract_strided_slice %12 {offsets = [0, 0, 8], sizes = [2, 8, 8], strides = [1, 1, 1]} : vector<2x8x32xf32> to vector<2x8x8xf32>
    %35 = vector.extract_strided_slice %13 {offsets = [0, 0, 8], sizes = [2, 8, 8], strides = [1, 1, 1]} : vector<2x8x32xf32> to vector<2x8x8xf32>
    "tpu.trace_start"() <{level = 10 : i32, message = "bqd,bkd->bqk"}> : () -> ()
    %cst_16 = arith.constant dense<0.000000e+00> : vector<2x8x8xf32>
    %36 = tpu.matmul %33, %34, %cst_16 {dimension_numbers = #tpu.dot_dimension_numbers<[2], [2], [1], [1], [0, 0, 0, 1, 1, 1], [0], [0]>} : vector<2x8x8xf32>, vector<2x8x8xf32>, vector<2x8x8xf32> -> vector<2x8x8xf32>
    "tpu.trace_stop"() : () -> ()
    %cst_17 = arith.constant dense<0xFF800000> : vector<2x8xf32>
    %37 = vector.multi_reduction <maximumf>, %36, %cst_17 [2] : vector<2x8x8xf32> to vector<2x8xf32>
    %38 = vector.shape_cast %37 : vector<2x8xf32> to vector<2x8x1xf32>
    %39 = vector.broadcast %38 : vector<2x8x1xf32> to vector<2x8x8xf32>
    %40 = arith.subf %36, %39 : vector<2x8x8xf32>
    %41 = math.exp %40 : vector<2x8x8xf32>
    %cst_18 = arith.constant dense<0.000000e+00> : vector<2x8xf32>
    %42 = vector.multi_reduction <add>, %41, %cst_18 [2] : vector<2x8x8xf32> to vector<2x8xf32>
    %43 = vector.shape_cast %42 : vector<2x8xf32> to vector<2x8x1xf32>
    "tpu.trace_start"() <{level = 10 : i32, message = "bqk,bkd->bqd"}> : () -> ()
    %cst_19 = arith.constant dense<0.000000e+00> : vector<2x8x8xf32>
    %44 = tpu.matmul %41, %35, %cst_19 {dimension_numbers = #tpu.dot_dimension_numbers<[2], [1], [1], [2], [0, 0, 0, 1, 1, 2], [0], [0]>} : vector<2x8x8xf32>, vector<2x8x8xf32>, vector<2x8x8xf32> -> vector<2x8x8xf32>
    "tpu.trace_stop"() : () -> ()
    %45 = tpu.reciprocal %43 {approx = true} : vector<2x8x1xf32> -> vector<2x8x1xf32>
    %46 = vector.broadcast %45 : vector<2x8x1xf32> to vector<2x8x8xf32>
    %47 = arith.mulf %44, %46 : vector<2x8x8xf32>
    %48 = vector.shape_cast %47 : vector<2x8x8xf32> to vector<16x8xf32>
    %49 = arith.truncf %48 : vector<16x8xf32> to vector<16x8xbf16>
    %c8 = arith.constant 8 : index
    %c0_20 = arith.constant 0 : index
    %50 = vector.load %arg5[%c8, %c0_20] : memref<32x32xbf16, #tpu.memory_space<vmem>>, vector<8x32xbf16>
    %cst_21 = arith.constant dense<0.000000e+00> : vector<16x32xf32>
    %51 = tpu.matmul %49, %50, %cst_21 {dimension_numbers = #tpu.dot_dimension_numbers<[1], [0], [0], [1], [0, 0, 1, 1], [], []>} : vector<16x8xbf16>, vector<8x32xbf16>, vector<16x32xf32> -> vector<16x32xf32>
    %52 = arith.addf %32, %51 : vector<16x32xf32>
    %53 = vector.extract_strided_slice %11 {offsets = [0, 0, 16], sizes = [2, 8, 8], strides = [1, 1, 1]} : vector<2x8x32xf32> to vector<2x8x8xf32>
    %54 = vector.extract_strided_slice %12 {offsets = [0, 0, 16], sizes = [2, 8, 8], strides = [1, 1, 1]} : vector<2x8x32xf32> to vector<2x8x8xf32>
    %55 = vector.extract_strided_slice %13 {offsets = [0, 0, 16], sizes = [2, 8, 8], strides = [1, 1, 1]} : vector<2x8x32xf32> to vector<2x8x8xf32>
    "tpu.trace_start"() <{level = 10 : i32, message = "bqd,bkd->bqk"}> : () -> ()
    %cst_22 = arith.constant dense<0.000000e+00> : vector<2x8x8xf32>
    %56 = tpu.matmul %53, %54, %cst_22 {dimension_numbers = #tpu.dot_dimension_numbers<[2], [2], [1], [1], [0, 0, 0, 1, 1, 1], [0], [0]>} : vector<2x8x8xf32>, vector<2x8x8xf32>, vector<2x8x8xf32> -> vector<2x8x8xf32>
    "tpu.trace_stop"() : () -> ()
    %cst_23 = arith.constant dense<0xFF800000> : vector<2x8xf32>
    %57 = vector.multi_reduction <maximumf>, %56, %cst_23 [2] : vector<2x8x8xf32> to vector<2x8xf32>
    %58 = vector.shape_cast %57 : vector<2x8xf32> to vector<2x8x1xf32>
    %59 = vector.broadcast %58 : vector<2x8x1xf32> to vector<2x8x8xf32>
    %60 = arith.subf %56, %59 : vector<2x8x8xf32>
    %61 = math.exp %60 : vector<2x8x8xf32>
    %cst_24 = arith.constant dense<0.000000e+00> : vector<2x8xf32>
    %62 = vector.multi_reduction <add>, %61, %cst_24 [2] : vector<2x8x8xf32> to vector<2x8xf32>
    %63 = vector.shape_cast %62 : vector<2x8xf32> to vector<2x8x1xf32>
    "tpu.trace_start"() <{level = 10 : i32, message = "bqk,bkd->bqd"}> : () -> ()
    %cst_25 = arith.constant dense<0.000000e+00> : vector<2x8x8xf32>
    %64 = tpu.matmul %61, %55, %cst_25 {dimension_numbers = #tpu.dot_dimension_numbers<[2], [1], [1], [2], [0, 0, 0, 1, 1, 2], [0], [0]>} : vector<2x8x8xf32>, vector<2x8x8xf32>, vector<2x8x8xf32> -> vector<2x8x8xf32>
    "tpu.trace_stop"() : () -> ()
    %65 = tpu.reciprocal %63 {approx = true} : vector<2x8x1xf32> -> vector<2x8x1xf32>
    %66 = vector.broadcast %65 : vector<2x8x1xf32> to vector<2x8x8xf32>
    %67 = arith.mulf %64, %66 : vector<2x8x8xf32>
    %68 = vector.shape_cast %67 : vector<2x8x8xf32> to vector<16x8xf32>
    %69 = arith.truncf %68 : vector<16x8xf32> to vector<16x8xbf16>
    %c16 = arith.constant 16 : index
    %c0_26 = arith.constant 0 : index
    %70 = vector.load %arg5[%c16, %c0_26] : memref<32x32xbf16, #tpu.memory_space<vmem>>, vector<8x32xbf16>
    %cst_27 = arith.constant dense<0.000000e+00> : vector<16x32xf32>
    %71 = tpu.matmul %69, %70, %cst_27 {dimension_numbers = #tpu.dot_dimension_numbers<[1], [0], [0], [1], [0, 0, 1, 1], [], []>} : vector<16x8xbf16>, vector<8x32xbf16>, vector<16x32xf32> -> vector<16x32xf32>
    %72 = arith.addf %52, %71 : vector<16x32xf32>
    %73 = vector.extract_strided_slice %11 {offsets = [0, 0, 24], sizes = [2, 8, 8], strides = [1, 1, 1]} : vector<2x8x32xf32> to vector<2x8x8xf32>
    %74 = vector.extract_strided_slice %12 {offsets = [0, 0, 24], sizes = [2, 8, 8], strides = [1, 1, 1]} : vector<2x8x32xf32> to vector<2x8x8xf32>
    %75 = vector.extract_strided_slice %13 {offsets = [0, 0, 24], sizes = [2, 8, 8], strides = [1, 1, 1]} : vector<2x8x32xf32> to vector<2x8x8xf32>
    "tpu.trace_start"() <{level = 10 : i32, message = "bqd,bkd->bqk"}> : () -> ()
    %cst_28 = arith.constant dense<0.000000e+00> : vector<2x8x8xf32>
    %76 = tpu.matmul %73, %74, %cst_28 {dimension_numbers = #tpu.dot_dimension_numbers<[2], [2], [1], [1], [0, 0, 0, 1, 1, 1], [0], [0]>} : vector<2x8x8xf32>, vector<2x8x8xf32>, vector<2x8x8xf32> -> vector<2x8x8xf32>
    "tpu.trace_stop"() : () -> ()
    %cst_29 = arith.constant dense<0xFF800000> : vector<2x8xf32>
    %77 = vector.multi_reduction <maximumf>, %76, %cst_29 [2] : vector<2x8x8xf32> to vector<2x8xf32>
    %78 = vector.shape_cast %77 : vector<2x8xf32> to vector<2x8x1xf32>
    %79 = vector.broadcast %78 : vector<2x8x1xf32> to vector<2x8x8xf32>
    %80 = arith.subf %76, %79 : vector<2x8x8xf32>
    %81 = math.exp %80 : vector<2x8x8xf32>
    %cst_30 = arith.constant dense<0.000000e+00> : vector<2x8xf32>
    %82 = vector.multi_reduction <add>, %81, %cst_30 [2] : vector<2x8x8xf32> to vector<2x8xf32>
    %83 = vector.shape_cast %82 : vector<2x8xf32> to vector<2x8x1xf32>
    "tpu.trace_start"() <{level = 10 : i32, message = "bqk,bkd->bqd"}> : () -> ()
    %cst_31 = arith.constant dense<0.000000e+00> : vector<2x8x8xf32>
    %84 = tpu.matmul %81, %75, %cst_31 {dimension_numbers = #tpu.dot_dimension_numbers<[2], [1], [1], [2], [0, 0, 0, 1, 1, 2], [0], [0]>} : vector<2x8x8xf32>, vector<2x8x8xf32>, vector<2x8x8xf32> -> vector<2x8x8xf32>
    "tpu.trace_stop"() : () -> ()
    %85 = tpu.reciprocal %83 {approx = true} : vector<2x8x1xf32> -> vector<2x8x1xf32>
    %86 = vector.broadcast %85 : vector<2x8x1xf32> to vector<2x8x8xf32>
    %87 = arith.mulf %84, %86 : vector<2x8x8xf32>
    %88 = vector.shape_cast %87 : vector<2x8x8xf32> to vector<16x8xf32>
    %89 = arith.truncf %88 : vector<16x8xf32> to vector<16x8xbf16>
    %c24 = arith.constant 24 : index
    %c0_32 = arith.constant 0 : index
    %90 = vector.load %arg5[%c24, %c0_32] : memref<32x32xbf16, #tpu.memory_space<vmem>>, vector<8x32xbf16>
    %cst_33 = arith.constant dense<0.000000e+00> : vector<16x32xf32>
    %91 = tpu.matmul %89, %90, %cst_33 {dimension_numbers = #tpu.dot_dimension_numbers<[1], [0], [0], [1], [0, 0, 1, 1], [], []>} : vector<16x8xbf16>, vector<8x32xbf16>, vector<16x32xf32> -> vector<16x32xf32>
    %92 = arith.addf %72, %91 : vector<16x32xf32>
    %c1 = arith.constant 1 : index
    %c0_34 = arith.constant 0 : index
    %93 = vector.load %arg3[%c1, %c0_34] : memref<13x128xf32, #tpu.memory_space<vmem>>, vector<1x32xf32>
    %94 = vector.broadcast %93 : vector<1x32xf32> to vector<16x32xf32>
    %95 = arith.addf %92, %94 : vector<16x32xf32>
    %c7 = arith.constant 7 : index
    %c0_35 = arith.constant 0 : index
    %96 = vector.load %arg3[%c7, %c0_35] : memref<13x128xf32, #tpu.memory_space<vmem>>, vector<1x32xf32>
    %c8_36 = arith.constant 8 : index
    %c0_37 = arith.constant 0 : index
    %97 = vector.load %arg3[%c8_36, %c0_37] : memref<13x128xf32, #tpu.memory_space<vmem>>, vector<1x32xf32>
    %cst_38 = arith.constant dense<0.000000e+00> : vector<16xf32>
    %98 = vector.multi_reduction <add>, %95, %cst_38 [1] : vector<16x32xf32> to vector<16xf32>
    %99 = vector.shape_cast %98 : vector<16xf32> to vector<16x1xf32>
    %cst_39 = arith.constant 3.200000e+01 : f32
    %100 = vector.broadcast %cst_39 : f32 to vector<16x1xf32>
    %101 = arith.divf %99, %100 : vector<16x1xf32>
    %102 = vector.broadcast %101 : vector<16x1xf32> to vector<16x32xf32>
    %103 = arith.subf %95, %102 : vector<16x32xf32>
    %104 = arith.mulf %103, %103 : vector<16x32xf32>
    %cst_40 = arith.constant dense<0.000000e+00> : vector<16xf32>
    %105 = vector.multi_reduction <add>, %104, %cst_40 [1] : vector<16x32xf32> to vector<16xf32>
    %106 = vector.shape_cast %105 : vector<16xf32> to vector<16x1xf32>
    %cst_41 = arith.constant 3.200000e+01 : f32
    %107 = vector.broadcast %cst_41 : f32 to vector<16x1xf32>
    %108 = arith.divf %106, %107 : vector<16x1xf32>
    %cst_42 = arith.constant 9.99999974E-6 : f32
    %109 = vector.broadcast %cst_42 : f32 to vector<16x1xf32>
    %110 = arith.addf %108, %109 : vector<16x1xf32>
    %111 = math.rsqrt %110 : vector<16x1xf32>
    %112 = vector.broadcast %111 : vector<16x1xf32> to vector<16x32xf32>
    %113 = arith.mulf %103, %112 : vector<16x32xf32>
    %114 = vector.broadcast %96 : vector<1x32xf32> to vector<16x32xf32>
    %115 = arith.mulf %113, %114 : vector<16x32xf32>
    %116 = vector.broadcast %97 : vector<1x32xf32> to vector<16x32xf32>
    %117 = arith.addf %115, %116 : vector<16x32xf32>
    %118 = arith.addf %117, %1 : vector<16x32xf32>
    %119 = arith.truncf %118 : vector<16x32xf32> to vector<16x32xbf16>
    %c0_43 = arith.constant 0 : index
    %c0_44 = arith.constant 0 : index
    %120 = vector.load %arg6[%c0_43, %c0_44] : memref<32x32xbf16, #tpu.memory_space<vmem>>, vector<32x32xbf16>
    %cst_45 = arith.constant dense<0.000000e+00> : vector<16x32xf32>
    %121 = tpu.matmul %119, %120, %cst_45 {dimension_numbers = #tpu.dot_dimension_numbers<[1], [0], [0], [1], [0, 0, 1, 1], [], []>} : vector<16x32xbf16>, vector<32x32xbf16>, vector<16x32xf32> -> vector<16x32xf32>
    %c2 = arith.constant 2 : index
    %c0_46 = arith.constant 0 : index
    %122 = vector.load %arg3[%c2, %c0_46] : memref<13x128xf32, #tpu.memory_space<vmem>>, vector<1x32xf32>
    %123 = vector.broadcast %122 : vector<1x32xf32> to vector<16x32xf32>
    %124 = arith.addf %121, %123 : vector<16x32xf32>
    %125 = arith.truncf %3 : vector<32x32xf32> to vector<32x32xbf16>
    %c0_47 = arith.constant 0 : index
    %c0_48 = arith.constant 0 : index
    %126 = vector.load %arg7[%c0_47, %c0_48] : memref<32x64xbf16, #tpu.memory_space<vmem>>, vector<32x64xbf16>
    %cst_49 = arith.constant dense<0.000000e+00> : vector<32x64xf32>
    %127 = tpu.matmul %125, %126, %cst_49 {dimension_numbers = #tpu.dot_dimension_numbers<[1], [0], [0], [1], [0, 0, 1, 1], [], []>} : vector<32x32xbf16>, vector<32x64xbf16>, vector<32x64xf32> -> vector<32x64xf32>
    %c3 = arith.constant 3 : index
    %c0_50 = arith.constant 0 : index
    %128 = vector.load %arg3[%c3, %c0_50] : memref<13x128xf32, #tpu.memory_space<vmem>>, vector<1x64xf32>
    %129 = vector.broadcast %128 : vector<1x64xf32> to vector<32x64xf32>
    %130 = arith.addf %127, %129 : vector<32x64xf32>
    %131 = vector.shape_cast %130 : vector<32x64xf32> to vector<2x16x64xf32>
    %132 = vector.shape_cast %124 : vector<16x32xf32> to vector<2x8x32xf32>
    %133 = vector.extract_strided_slice %131 {offsets = [0, 0, 0], sizes = [2, 16, 32], strides = [1, 1, 1]} : vector<2x16x64xf32> to vector<2x16x32xf32>
    %134 = vector.extract_strided_slice %131 {offsets = [0, 0, 32], sizes = [2, 16, 32], strides = [1, 1, 1]} : vector<2x16x64xf32> to vector<2x16x32xf32>
    %135 = vector.extract_strided_slice %132 {offsets = [0, 0, 0], sizes = [2, 8, 8], strides = [1, 1, 1]} : vector<2x8x32xf32> to vector<2x8x8xf32>
    %136 = vector.extract_strided_slice %133 {offsets = [0, 0, 0], sizes = [2, 16, 8], strides = [1, 1, 1]} : vector<2x16x32xf32> to vector<2x16x8xf32>
    %137 = vector.extract_strided_slice %134 {offsets = [0, 0, 0], sizes = [2, 16, 8], strides = [1, 1, 1]} : vector<2x16x32xf32> to vector<2x16x8xf32>
    "tpu.trace_start"() <{level = 10 : i32, message = "bqd,bkd->bqk"}> : () -> ()
    %cst_51 = arith.constant dense<0.000000e+00> : vector<2x8x16xf32>
    %138 = tpu.matmul %135, %136, %cst_51 {dimension_numbers = #tpu.dot_dimension_numbers<[2], [2], [1], [1], [0, 0, 0, 1, 1, 1], [0], [0]>} : vector<2x8x8xf32>, vector<2x16x8xf32>, vector<2x8x16xf32> -> vector<2x8x16xf32>
    "tpu.trace_stop"() : () -> ()
    %cst_52 = arith.constant dense<0xFF800000> : vector<2x8xf32>
    %139 = vector.multi_reduction <maximumf>, %138, %cst_52 [2] : vector<2x8x16xf32> to vector<2x8xf32>
    %140 = vector.shape_cast %139 : vector<2x8xf32> to vector<2x8x1xf32>
    %141 = vector.broadcast %140 : vector<2x8x1xf32> to vector<2x8x16xf32>
    %142 = arith.subf %138, %141 : vector<2x8x16xf32>
    %143 = math.exp %142 : vector<2x8x16xf32>
    %cst_53 = arith.constant dense<0.000000e+00> : vector<2x8xf32>
    %144 = vector.multi_reduction <add>, %143, %cst_53 [2] : vector<2x8x16xf32> to vector<2x8xf32>
    %145 = vector.shape_cast %144 : vector<2x8xf32> to vector<2x8x1xf32>
    "tpu.trace_start"() <{level = 10 : i32, message = "bqk,bkd->bqd"}> : () -> ()
    %cst_54 = arith.constant dense<0.000000e+00> : vector<2x8x8xf32>
    %146 = tpu.matmul %143, %137, %cst_54 {dimension_numbers = #tpu.dot_dimension_numbers<[2], [1], [1], [2], [0, 0, 0, 1, 1, 2], [0], [0]>} : vector<2x8x16xf32>, vector<2x16x8xf32>, vector<2x8x8xf32> -> vector<2x8x8xf32>
    "tpu.trace_stop"() : () -> ()
    %147 = tpu.reciprocal %145 {approx = true} : vector<2x8x1xf32> -> vector<2x8x1xf32>
    %148 = vector.broadcast %147 : vector<2x8x1xf32> to vector<2x8x8xf32>
    %149 = arith.mulf %146, %148 : vector<2x8x8xf32>
    %150 = vector.shape_cast %149 : vector<2x8x8xf32> to vector<16x8xf32>
    %151 = arith.truncf %150 : vector<16x8xf32> to vector<16x8xbf16>
    %c0_55 = arith.constant 0 : index
    %c0_56 = arith.constant 0 : index
    %152 = vector.load %arg8[%c0_55, %c0_56] : memref<32x32xbf16, #tpu.memory_space<vmem>>, vector<8x32xbf16>
    %cst_57 = arith.constant dense<0.000000e+00> : vector<16x32xf32>
    %153 = tpu.matmul %151, %152, %cst_57 {dimension_numbers = #tpu.dot_dimension_numbers<[1], [0], [0], [1], [0, 0, 1, 1], [], []>} : vector<16x8xbf16>, vector<8x32xbf16>, vector<16x32xf32> -> vector<16x32xf32>
    %154 = vector.extract_strided_slice %132 {offsets = [0, 0, 8], sizes = [2, 8, 8], strides = [1, 1, 1]} : vector<2x8x32xf32> to vector<2x8x8xf32>
    %155 = vector.extract_strided_slice %133 {offsets = [0, 0, 8], sizes = [2, 16, 8], strides = [1, 1, 1]} : vector<2x16x32xf32> to vector<2x16x8xf32>
    %156 = vector.extract_strided_slice %134 {offsets = [0, 0, 8], sizes = [2, 16, 8], strides = [1, 1, 1]} : vector<2x16x32xf32> to vector<2x16x8xf32>
    "tpu.trace_start"() <{level = 10 : i32, message = "bqd,bkd->bqk"}> : () -> ()
    %cst_58 = arith.constant dense<0.000000e+00> : vector<2x8x16xf32>
    %157 = tpu.matmul %154, %155, %cst_58 {dimension_numbers = #tpu.dot_dimension_numbers<[2], [2], [1], [1], [0, 0, 0, 1, 1, 1], [0], [0]>} : vector<2x8x8xf32>, vector<2x16x8xf32>, vector<2x8x16xf32> -> vector<2x8x16xf32>
    "tpu.trace_stop"() : () -> ()
    %cst_59 = arith.constant dense<0xFF800000> : vector<2x8xf32>
    %158 = vector.multi_reduction <maximumf>, %157, %cst_59 [2] : vector<2x8x16xf32> to vector<2x8xf32>
    %159 = vector.shape_cast %158 : vector<2x8xf32> to vector<2x8x1xf32>
    %160 = vector.broadcast %159 : vector<2x8x1xf32> to vector<2x8x16xf32>
    %161 = arith.subf %157, %160 : vector<2x8x16xf32>
    %162 = math.exp %161 : vector<2x8x16xf32>
    %cst_60 = arith.constant dense<0.000000e+00> : vector<2x8xf32>
    %163 = vector.multi_reduction <add>, %162, %cst_60 [2] : vector<2x8x16xf32> to vector<2x8xf32>
    %164 = vector.shape_cast %163 : vector<2x8xf32> to vector<2x8x1xf32>
    "tpu.trace_start"() <{level = 10 : i32, message = "bqk,bkd->bqd"}> : () -> ()
    %cst_61 = arith.constant dense<0.000000e+00> : vector<2x8x8xf32>
    %165 = tpu.matmul %162, %156, %cst_61 {dimension_numbers = #tpu.dot_dimension_numbers<[2], [1], [1], [2], [0, 0, 0, 1, 1, 2], [0], [0]>} : vector<2x8x16xf32>, vector<2x16x8xf32>, vector<2x8x8xf32> -> vector<2x8x8xf32>
    "tpu.trace_stop"() : () -> ()
    %166 = tpu.reciprocal %164 {approx = true} : vector<2x8x1xf32> -> vector<2x8x1xf32>
    %167 = vector.broadcast %166 : vector<2x8x1xf32> to vector<2x8x8xf32>
    %168 = arith.mulf %165, %167 : vector<2x8x8xf32>
    %169 = vector.shape_cast %168 : vector<2x8x8xf32> to vector<16x8xf32>
    %170 = arith.truncf %169 : vector<16x8xf32> to vector<16x8xbf16>
    %c8_62 = arith.constant 8 : index
    %c0_63 = arith.constant 0 : index
    %171 = vector.load %arg8[%c8_62, %c0_63] : memref<32x32xbf16, #tpu.memory_space<vmem>>, vector<8x32xbf16>
    %cst_64 = arith.constant dense<0.000000e+00> : vector<16x32xf32>
    %172 = tpu.matmul %170, %171, %cst_64 {dimension_numbers = #tpu.dot_dimension_numbers<[1], [0], [0], [1], [0, 0, 1, 1], [], []>} : vector<16x8xbf16>, vector<8x32xbf16>, vector<16x32xf32> -> vector<16x32xf32>
    %173 = arith.addf %153, %172 : vector<16x32xf32>
    %174 = vector.extract_strided_slice %132 {offsets = [0, 0, 16], sizes = [2, 8, 8], strides = [1, 1, 1]} : vector<2x8x32xf32> to vector<2x8x8xf32>
    %175 = vector.extract_strided_slice %133 {offsets = [0, 0, 16], sizes = [2, 16, 8], strides = [1, 1, 1]} : vector<2x16x32xf32> to vector<2x16x8xf32>
    %176 = vector.extract_strided_slice %134 {offsets = [0, 0, 16], sizes = [2, 16, 8], strides = [1, 1, 1]} : vector<2x16x32xf32> to vector<2x16x8xf32>
    "tpu.trace_start"() <{level = 10 : i32, message = "bqd,bkd->bqk"}> : () -> ()
    %cst_65 = arith.constant dense<0.000000e+00> : vector<2x8x16xf32>
    %177 = tpu.matmul %174, %175, %cst_65 {dimension_numbers = #tpu.dot_dimension_numbers<[2], [2], [1], [1], [0, 0, 0, 1, 1, 1], [0], [0]>} : vector<2x8x8xf32>, vector<2x16x8xf32>, vector<2x8x16xf32> -> vector<2x8x16xf32>
    "tpu.trace_stop"() : () -> ()
    %cst_66 = arith.constant dense<0xFF800000> : vector<2x8xf32>
    %178 = vector.multi_reduction <maximumf>, %177, %cst_66 [2] : vector<2x8x16xf32> to vector<2x8xf32>
    %179 = vector.shape_cast %178 : vector<2x8xf32> to vector<2x8x1xf32>
    %180 = vector.broadcast %179 : vector<2x8x1xf32> to vector<2x8x16xf32>
    %181 = arith.subf %177, %180 : vector<2x8x16xf32>
    %182 = math.exp %181 : vector<2x8x16xf32>
    %cst_67 = arith.constant dense<0.000000e+00> : vector<2x8xf32>
    %183 = vector.multi_reduction <add>, %182, %cst_67 [2] : vector<2x8x16xf32> to vector<2x8xf32>
    %184 = vector.shape_cast %183 : vector<2x8xf32> to vector<2x8x1xf32>
    "tpu.trace_start"() <{level = 10 : i32, message = "bqk,bkd->bqd"}> : () -> ()
    %cst_68 = arith.constant dense<0.000000e+00> : vector<2x8x8xf32>
    %185 = tpu.matmul %182, %176, %cst_68 {dimension_numbers = #tpu.dot_dimension_numbers<[2], [1], [1], [2], [0, 0, 0, 1, 1, 2], [0], [0]>} : vector<2x8x16xf32>, vector<2x16x8xf32>, vector<2x8x8xf32> -> vector<2x8x8xf32>
    "tpu.trace_stop"() : () -> ()
    %186 = tpu.reciprocal %184 {approx = true} : vector<2x8x1xf32> -> vector<2x8x1xf32>
    %187 = vector.broadcast %186 : vector<2x8x1xf32> to vector<2x8x8xf32>
    %188 = arith.mulf %185, %187 : vector<2x8x8xf32>
    %189 = vector.shape_cast %188 : vector<2x8x8xf32> to vector<16x8xf32>
    %190 = arith.truncf %189 : vector<16x8xf32> to vector<16x8xbf16>
    %c16_69 = arith.constant 16 : index
    %c0_70 = arith.constant 0 : index
    %191 = vector.load %arg8[%c16_69, %c0_70] : memref<32x32xbf16, #tpu.memory_space<vmem>>, vector<8x32xbf16>
    %cst_71 = arith.constant dense<0.000000e+00> : vector<16x32xf32>
    %192 = tpu.matmul %190, %191, %cst_71 {dimension_numbers = #tpu.dot_dimension_numbers<[1], [0], [0], [1], [0, 0, 1, 1], [], []>} : vector<16x8xbf16>, vector<8x32xbf16>, vector<16x32xf32> -> vector<16x32xf32>
    %193 = arith.addf %173, %192 : vector<16x32xf32>
    %194 = vector.extract_strided_slice %132 {offsets = [0, 0, 24], sizes = [2, 8, 8], strides = [1, 1, 1]} : vector<2x8x32xf32> to vector<2x8x8xf32>
    %195 = vector.extract_strided_slice %133 {offsets = [0, 0, 24], sizes = [2, 16, 8], strides = [1, 1, 1]} : vector<2x16x32xf32> to vector<2x16x8xf32>
    %196 = vector.extract_strided_slice %134 {offsets = [0, 0, 24], sizes = [2, 16, 8], strides = [1, 1, 1]} : vector<2x16x32xf32> to vector<2x16x8xf32>
    "tpu.trace_start"() <{level = 10 : i32, message = "bqd,bkd->bqk"}> : () -> ()
    %cst_72 = arith.constant dense<0.000000e+00> : vector<2x8x16xf32>
    %197 = tpu.matmul %194, %195, %cst_72 {dimension_numbers = #tpu.dot_dimension_numbers<[2], [2], [1], [1], [0, 0, 0, 1, 1, 1], [0], [0]>} : vector<2x8x8xf32>, vector<2x16x8xf32>, vector<2x8x16xf32> -> vector<2x8x16xf32>
    "tpu.trace_stop"() : () -> ()
    %cst_73 = arith.constant dense<0xFF800000> : vector<2x8xf32>
    %198 = vector.multi_reduction <maximumf>, %197, %cst_73 [2] : vector<2x8x16xf32> to vector<2x8xf32>
    %199 = vector.shape_cast %198 : vector<2x8xf32> to vector<2x8x1xf32>
    %200 = vector.broadcast %199 : vector<2x8x1xf32> to vector<2x8x16xf32>
    %201 = arith.subf %197, %200 : vector<2x8x16xf32>
    %202 = math.exp %201 : vector<2x8x16xf32>
    %cst_74 = arith.constant dense<0.000000e+00> : vector<2x8xf32>
    %203 = vector.multi_reduction <add>, %202, %cst_74 [2] : vector<2x8x16xf32> to vector<2x8xf32>
    %204 = vector.shape_cast %203 : vector<2x8xf32> to vector<2x8x1xf32>
    "tpu.trace_start"() <{level = 10 : i32, message = "bqk,bkd->bqd"}> : () -> ()
    %cst_75 = arith.constant dense<0.000000e+00> : vector<2x8x8xf32>
    %205 = tpu.matmul %202, %196, %cst_75 {dimension_numbers = #tpu.dot_dimension_numbers<[2], [1], [1], [2], [0, 0, 0, 1, 1, 2], [0], [0]>} : vector<2x8x16xf32>, vector<2x16x8xf32>, vector<2x8x8xf32> -> vector<2x8x8xf32>
    "tpu.trace_stop"() : () -> ()
    %206 = tpu.reciprocal %204 {approx = true} : vector<2x8x1xf32> -> vector<2x8x1xf32>
    %207 = vector.broadcast %206 : vector<2x8x1xf32> to vector<2x8x8xf32>
    %208 = arith.mulf %205, %207 : vector<2x8x8xf32>
    %209 = vector.shape_cast %208 : vector<2x8x8xf32> to vector<16x8xf32>
    %210 = arith.truncf %209 : vector<16x8xf32> to vector<16x8xbf16>
    %c24_76 = arith.constant 24 : index
    %c0_77 = arith.constant 0 : index
    %211 = vector.load %arg8[%c24_76, %c0_77] : memref<32x32xbf16, #tpu.memory_space<vmem>>, vector<8x32xbf16>
    %cst_78 = arith.constant dense<0.000000e+00> : vector<16x32xf32>
    %212 = tpu.matmul %210, %211, %cst_78 {dimension_numbers = #tpu.dot_dimension_numbers<[1], [0], [0], [1], [0, 0, 1, 1], [], []>} : vector<16x8xbf16>, vector<8x32xbf16>, vector<16x32xf32> -> vector<16x32xf32>
    %213 = arith.addf %193, %212 : vector<16x32xf32>
    %c4 = arith.constant 4 : index
    %c0_79 = arith.constant 0 : index
    %214 = vector.load %arg3[%c4, %c0_79] : memref<13x128xf32, #tpu.memory_space<vmem>>, vector<1x32xf32>
    %215 = vector.broadcast %214 : vector<1x32xf32> to vector<16x32xf32>
    %216 = arith.addf %213, %215 : vector<16x32xf32>
    %c9 = arith.constant 9 : index
    %c0_80 = arith.constant 0 : index
    %217 = vector.load %arg3[%c9, %c0_80] : memref<13x128xf32, #tpu.memory_space<vmem>>, vector<1x32xf32>
    %c10 = arith.constant 10 : index
    %c0_81 = arith.constant 0 : index
    %218 = vector.load %arg3[%c10, %c0_81] : memref<13x128xf32, #tpu.memory_space<vmem>>, vector<1x32xf32>
    %cst_82 = arith.constant dense<0.000000e+00> : vector<16xf32>
    %219 = vector.multi_reduction <add>, %216, %cst_82 [1] : vector<16x32xf32> to vector<16xf32>
    %220 = vector.shape_cast %219 : vector<16xf32> to vector<16x1xf32>
    %cst_83 = arith.constant 3.200000e+01 : f32
    %221 = vector.broadcast %cst_83 : f32 to vector<16x1xf32>
    %222 = arith.divf %220, %221 : vector<16x1xf32>
    %223 = vector.broadcast %222 : vector<16x1xf32> to vector<16x32xf32>
    %224 = arith.subf %216, %223 : vector<16x32xf32>
    %225 = arith.mulf %224, %224 : vector<16x32xf32>
    %cst_84 = arith.constant dense<0.000000e+00> : vector<16xf32>
    %226 = vector.multi_reduction <add>, %225, %cst_84 [1] : vector<16x32xf32> to vector<16xf32>
    %227 = vector.shape_cast %226 : vector<16xf32> to vector<16x1xf32>
    %cst_85 = arith.constant 3.200000e+01 : f32
    %228 = vector.broadcast %cst_85 : f32 to vector<16x1xf32>
    %229 = arith.divf %227, %228 : vector<16x1xf32>
    %cst_86 = arith.constant 9.99999974E-6 : f32
    %230 = vector.broadcast %cst_86 : f32 to vector<16x1xf32>
    %231 = arith.addf %229, %230 : vector<16x1xf32>
    %232 = math.rsqrt %231 : vector<16x1xf32>
    %233 = vector.broadcast %232 : vector<16x1xf32> to vector<16x32xf32>
    %234 = arith.mulf %224, %233 : vector<16x32xf32>
    %235 = vector.broadcast %217 : vector<1x32xf32> to vector<16x32xf32>
    %236 = arith.mulf %234, %235 : vector<16x32xf32>
    %237 = vector.broadcast %218 : vector<1x32xf32> to vector<16x32xf32>
    %238 = arith.addf %236, %237 : vector<16x32xf32>
    %239 = arith.addf %238, %118 : vector<16x32xf32>
    %240 = arith.truncf %239 : vector<16x32xf32> to vector<16x32xbf16>
    %c0_87 = arith.constant 0 : index
    %c0_88 = arith.constant 0 : index
    %241 = vector.load %arg9[%c0_87, %c0_88] : memref<32x128xbf16, #tpu.memory_space<vmem>>, vector<32x128xbf16>
    %cst_89 = arith.constant dense<0.000000e+00> : vector<16x128xf32>
    %242 = tpu.matmul %240, %241, %cst_89 {dimension_numbers = #tpu.dot_dimension_numbers<[1], [0], [0], [1], [0, 0, 1, 1], [], []>} : vector<16x32xbf16>, vector<32x128xbf16>, vector<16x128xf32> -> vector<16x128xf32>
    %c5 = arith.constant 5 : index
    %c0_90 = arith.constant 0 : index
    %243 = vector.load %arg3[%c5, %c0_90] : memref<13x128xf32, #tpu.memory_space<vmem>>, vector<1x128xf32>
    %244 = vector.broadcast %243 : vector<1x128xf32> to vector<16x128xf32>
    %245 = arith.addf %242, %244 : vector<16x128xf32>
    %cst_91 = arith.constant 5.000000e-01 : f32
    %246 = vector.broadcast %cst_91 : f32 to vector<16x128xf32>
    %247 = arith.mulf %246, %245 : vector<16x128xf32>
    %cst_92 = arith.constant 4.471500e-02 : f32
    %248 = vector.broadcast %cst_92 : f32 to vector<16x128xf32>
    %249 = arith.mulf %248, %245 : vector<16x128xf32>
    %250 = arith.mulf %249, %245 : vector<16x128xf32>
    %251 = arith.mulf %250, %245 : vector<16x128xf32>
    %252 = arith.addf %245, %251 : vector<16x128xf32>
    %cst_93 = arith.constant 0.797884583 : f32
    %253 = vector.broadcast %cst_93 : f32 to vector<16x128xf32>
    %254 = arith.mulf %253, %252 : vector<16x128xf32>
    %255 = math.tanh %254 : vector<16x128xf32>
    %cst_94 = arith.constant 1.000000e+00 : f32
    %256 = vector.broadcast %cst_94 : f32 to vector<16x128xf32>
    %257 = arith.addf %256, %255 : vector<16x128xf32>
    %258 = arith.mulf %247, %257 : vector<16x128xf32>
    %259 = arith.truncf %258 : vector<16x128xf32> to vector<16x128xbf16>
    %c0_95 = arith.constant 0 : index
    %c0_96 = arith.constant 0 : index
    %260 = vector.load %arg10[%c0_95, %c0_96] : memref<128x32xbf16, #tpu.memory_space<vmem>>, vector<128x32xbf16>
    %cst_97 = arith.constant dense<0.000000e+00> : vector<16x32xf32>
    %261 = tpu.matmul %259, %260, %cst_97 {dimension_numbers = #tpu.dot_dimension_numbers<[1], [0], [0], [1], [0, 0, 1, 1], [], []>} : vector<16x128xbf16>, vector<128x32xbf16>, vector<16x32xf32> -> vector<16x32xf32>
    %c6 = arith.constant 6 : index
    %c0_98 = arith.constant 0 : index
    %262 = vector.load %arg3[%c6, %c0_98] : memref<13x128xf32, #tpu.memory_space<vmem>>, vector<1x32xf32>
    %263 = vector.broadcast %262 : vector<1x32xf32> to vector<16x32xf32>
    %264 = arith.addf %261, %263 : vector<16x32xf32>
    %c11 = arith.constant 11 : index
    %c0_99 = arith.constant 0 : index
    %265 = vector.load %arg3[%c11, %c0_99] : memref<13x128xf32, #tpu.memory_space<vmem>>, vector<1x32xf32>
    %c12 = arith.constant 12 : index
    %c0_100 = arith.constant 0 : index
    %266 = vector.load %arg3[%c12, %c0_100] : memref<13x128xf32, #tpu.memory_space<vmem>>, vector<1x32xf32>
    %cst_101 = arith.constant dense<0.000000e+00> : vector<16xf32>
    %267 = vector.multi_reduction <add>, %264, %cst_101 [1] : vector<16x32xf32> to vector<16xf32>
    %268 = vector.shape_cast %267 : vector<16xf32> to vector<16x1xf32>
    %cst_102 = arith.constant 3.200000e+01 : f32
    %269 = vector.broadcast %cst_102 : f32 to vector<16x1xf32>
    %270 = arith.divf %268, %269 : vector<16x1xf32>
    %271 = vector.broadcast %270 : vector<16x1xf32> to vector<16x32xf32>
    %272 = arith.subf %264, %271 : vector<16x32xf32>
    %273 = arith.mulf %272, %272 : vector<16x32xf32>
    %cst_103 = arith.constant dense<0.000000e+00> : vector<16xf32>
    %274 = vector.multi_reduction <add>, %273, %cst_103 [1] : vector<16x32xf32> to vector<16xf32>
    %275 = vector.shape_cast %274 : vector<16xf32> to vector<16x1xf32>
    %cst_104 = arith.constant 3.200000e+01 : f32
    %276 = vector.broadcast %cst_104 : f32 to vector<16x1xf32>
    %277 = arith.divf %275, %276 : vector<16x1xf32>
    %cst_105 = arith.constant 9.99999974E-6 : f32
    %278 = vector.broadcast %cst_105 : f32 to vector<16x1xf32>
    %279 = arith.addf %277, %278 : vector<16x1xf32>
    %280 = math.rsqrt %279 : vector<16x1xf32>
    %281 = vector.broadcast %280 : vector<16x1xf32> to vector<16x32xf32>
    %282 = arith.mulf %272, %281 : vector<16x32xf32>
    %283 = vector.broadcast %265 : vector<1x32xf32> to vector<16x32xf32>
    %284 = arith.mulf %282, %283 : vector<16x32xf32>
    %285 = vector.broadcast %266 : vector<1x32xf32> to vector<16x32xf32>
    %286 = arith.addf %284, %285 : vector<16x32xf32>
    %287 = arith.addf %286, %239 : vector<16x32xf32>
    %288 = vector.shape_cast %287 : vector<16x32xf32> to vector<2x8x32xf32>
    %c0_106 = arith.constant 0 : index
    %c0_107 = arith.constant 0 : index
    %c0_108 = arith.constant 0 : index
    %289 = vector.load %arg11[%c0_106, %c0_107, %c0_108] : memref<2x8x32xf32, #tpu.memory_space<vmem>>, vector<2x8x32xf32>
    tpu.vector_store %arg11[%c0_106, %c0_107, %c0_108], %288 {strides = array<i32>} : memref<2x8x32xf32, #tpu.memory_space<vmem>>, vector<2x8x32xf32>,
    return
  }
  func.func @transform_0(%arg0: i32) -> (i32, i32, i32) {
    %c0_i32 = arith.constant 0 : i32
    %c0_i32_0 = arith.constant 0 : i32
    %c0_i32_1 = arith.constant 0 : i32
    return %arg0, %c0_i32, %c0_i32_0 : i32, i32, i32
  }
  func.func @transform_1(%arg0: i32) -> (i32, i32, i32) {
    %c0_i32 = arith.constant 0 : i32
    %c0_i32_0 = arith.constant 0 : i32
    %c0_i32_1 = arith.constant 0 : i32
    return %arg0, %c0_i32, %c0_i32_0 : i32, i32, i32
  }
  func.func @transform_2(%arg0: i32) -> (i32, i32) {
    %c0_i32 = arith.constant 0 : i32
    %c0_i32_0 = arith.constant 0 : i32
    %c0_i32_1 = arith.constant 0 : i32
    return %c0_i32, %c0_i32_0 : i32, i32
  }
  func.func @transform_3(%arg0: i32) -> (i32, i32) {
    %c0_i32 = arith.constant 0 : i32
    %c0_i32_0 = arith.constant 0 : i32
    %c0_i32_1 = arith.constant 0 : i32
    return %c0_i32, %c0_i32_0 : i32, i32
  }
  func.func @transform_4(%arg0: i32) -> (i32, i32) {
    %c0_i32 = arith.constant 0 : i32
    %c0_i32_0 = arith.constant 0 : i32
    %c0_i32_1 = arith.constant 0 : i32
    return %c0_i32, %c0_i32_0 : i32, i32
  }
  func.func @transform_5(%arg0: i32) -> (i32, i32) {
    %c0_i32 = arith.constant 0 : i32
    %c0_i32_0 = arith.constant 0 : i32
    %c0_i32_1 = arith.constant 0 : i32
    return %c0_i32, %c0_i32_0 : i32, i32
  }
  func.func @transform_6(%arg0: i32) -> (i32, i32) {
    %c0_i32 = arith.constant 0 : i32
    %c0_i32_0 = arith.constant 0 : i32
    %c0_i32_1 = arith.constant 0 : i32
    return %c0_i32, %c0_i32_0 : i32, i32
  }
  func.func @transform_7(%arg0: i32) -> (i32, i32) {
    %c0_i32 = arith.constant 0 : i32
    %c0_i32_0 = arith.constant 0 : i32
    %c0_i32_1 = arith.constant 0 : i32
    return %c0_i32, %c0_i32_0 : i32, i32
  }
  func.func @transform_8(%arg0: i32) -> (i32, i32) {
    %c0_i32 = arith.constant 0 : i32
    %c0_i32_0 = arith.constant 0 : i32
    %c0_i32_1 = arith.constant 0 : i32
    return %c0_i32, %c0_i32_0 : i32, i32
  }
  func.func @transform_9(%arg0: i32) -> (i32, i32) {
    %c0_i32 = arith.constant 0 : i32
    %c0_i32_0 = arith.constant 0 : i32
    %c0_i32_1 = arith.constant 0 : i32
    return %c0_i32, %c0_i32_0 : i32, i32
  }
  func.func @transform_10(%arg0: i32) -> (i32, i32, i32) {
    %c0_i32 = arith.constant 0 : i32
    %c0_i32_0 = arith.constant 0 : i32
    %c0_i32_1 = arith.constant 0 : i32
    return %arg0, %c0_i32, %c0_i32_0 : i32, i32, i32
  }
}

</mosaic_0001>

<bundles_post_ra>
// kernel: tpu_custom_call.1
= control target key start
LH: loop header
LB: loop body
LE: loop exit
PB: predicated region body
PF: predicated region fallthrough
CT: control target
= control target key end

     0   :  { %15 = vsyncpa [#allocation3], 0  ;;  %s2826_s0 = inlined_call_operand.vmem [shape: f32[2,16,32], index: 0, kind: input, shape index: {}]   ;;  %s2827_s1 = inlined_call_operand.vmem [shape: f32[2,8,32], index: 1, kind: input, shape index: {}]   ;;  %s2828_s2 = inlined_call_operand.vmem [shape: f32[13,128], index: 2, kind: input, shape index: {}]   ;;  %s2829_s3 = inlined_call_operand.vmem [shape: bf16[32,96], index: 3, kind: input, shape index: {}]   ;;  %s2830_s4 = inlined_call_operand.hbm [shape: bf16[32,32], index: 4, kind: input, shape index: {}]   ;;  %s2831_s5 = inlined_call_operand.hbm [shape: bf16[32,32], index: 5, kind: input, shape index: {}]   ;;  %s2832_s6 = inlined_call_operand.hbm [shape: bf16[32,64], index: 6, kind: input, shape index: {}]   ;;  %s2833_s7 = inlined_call_operand.hbm [shape: bf16[32,32], index: 7, kind: input, shape index: {}]   ;;  %s2834_s8 = inlined_call_operand.hbm [shape: bf16[32,128], index: 8, kind: input, shape index: {}]   ;;  %s2835_s9 = inlined_call_operand.vmem [shape: bf16[128,32], index: 9, kind: input, shape index: {}]   ;;  %s2836_s10 = inlined_call_operand.hbm [shape: f32[2,8,32], index: 10, kind: output, shape index: {}]  }
   0x1   :  { %16 = vsyncpa [#allocation6], 0 }
   0x2   :  { %17 = vsyncpa [#allocation9], 0 }
   0x3   :  { %18 = vsyncpa [#allocation4], 0  ;;  %s44_s15 = sshll.u32 %s2831_s5, 4  ;;  %s2311_s16 = smov [#allocation5]   ;;  %s45_s15 = int_to_ptr.hbm [resolvable:$true] %s44_s15 }
   0x4   :  { %s46_s17 = sshll.u32 %s2311_s16, 4  ;;  %s70_s20 = sshll.u32 %s2833_s7, 4  ;;  %s47_s17 = int_to_ptr.vmem [resolvable:$true] %s46_s17  ;;  %s71_s20 = int_to_ptr.hbm [resolvable:$true] %s70_s20 }
   0x5   :  { %s2312_s21 = smov 64   ;;  %s2313_s22 = smov 4  }
   0x6   :  { %52 = dma.hbm_to_vmem [thread:$0]  %s45_s15, 256, %s47_s17, [#allocation6], %s2312_s21, %s2312_s21, %s2313_s22  }
   0x7   :  { %s2314_s23 = smov [#allocation8]   ;;  %s31_s5 = sshll.u32 %s2830_s4, 4  ;;  %s32_s5 = int_to_ptr.hbm [resolvable:$true] %s31_s5 }
   0x8   :  { %s72_s24 = sshll.u32 %s2314_s23, 4  ;;  %s57_s7 = sshll.u32 %s2832_s6, 4  ;;  %s73_s24 = int_to_ptr.vmem [resolvable:$true] %s72_s24  ;;  %s58_s7 = int_to_ptr.hbm [resolvable:$true] %s57_s7 }
   0x9   :  { %78 = dma.hbm_to_vmem [thread:$0]  %s71_s20, 256, %s73_s24, [#allocation9], %s2312_s21, %s2312_s21, %s2313_s22  }
   0xa   :  { %s2315_s29 = smov [#allocation2]   ;;  %s2316_s11 = smov [#allocation7]  }
   0xb   :  { %s33_s30 = sshll.u32 %s2315_s29, 4  ;;  %s59_s12 = sshll.u32 %s2316_s11, 4  ;;  %s34_s30 = int_to_ptr.vmem [resolvable:$true] %s33_s30  ;;  %s60_s12 = int_to_ptr.vmem [resolvable:$true] %s59_s12 }
   0xc   :  { %39 = dma.hbm_to_vmem [thread:$0]  %s32_s5, 256, %s34_s30, [#allocation3], %s2312_s21, %s2312_s21, %s2313_s22  }
   0xd   :  { %s83_s14 = sshll.u32 %s2834_s8, 4  ;;  %s2317_s15 = smov [#allocation10]   ;;  %s84_s14 = int_to_ptr.hbm [resolvable:$true] %s83_s14 }
   0xe   :  { %65 = dma.hbm_to_vmem [thread:$0]  %s58_s7, 256, %s60_s12, [#allocation6], %s2312_s21, %s2312_s21, %s2313_s22  }
   0xf   :  { %s85_s6 = sshll.u32 %s2317_s15, 4  ;;  %s86_s6 = int_to_ptr.vmem [resolvable:$true] %s85_s6 }
  0x10   :  { %91 = dma.hbm_to_vmem [thread:$0]  %s84_s14, 256, %s86_s6, [#allocation9], %s2312_s21, %s2312_s21, %s2313_s22  }
  0x11   :  { %2303 = dma.done.wait [#allocation3], 256  }
  0x12   :  { %2304 = vsyncadd [#allocation3], 4294967040 }
  0x13   :  { %2305 = dma.done.wait [#allocation6], 512  }
  0x14   :  { %2306 = vsyncadd [#allocation6], 4294966784 }
  0x15   :  { %2307 = dma.done.wait [#allocation9], 512  }
  0x16   :  { %2308 = vsyncadd [#allocation9], 4294966784  ;;  %v1983_v0 = vld [vmem:[%s2829_s3 + $0x8] sm:$0xff]  ;;  %v1982_v1 = vld [vmem:[%s2829_s3] sm:$0xff]  ;;  %vm140_vm0 = vcmask 261120   ;;  %s2318_s25 = smov 88  }
  0x17   :  { %v2421_v2 = vld [vmem:[%s2827_s1] sm:$0xff]  ;;  %v2426_v3 = vld [vmem:[%s2827_s1 + $0x8] sm:$0xff]  ;;  %150 = vmatpush.bf16.msra.mxu0 %v1983_v0  ;;  %s2319_s1 = smov 96   ;;  %s2320_s26 = smov 120   ;;  %vm161_vm1 = vcmask 64512   ;;  %vm424_vm2 = vcmask 1043456  }
  0x18   :  { %v121_v4 = vpack.c.bf16 %v2426_v3, %v2421_v2  ;;  %v2064_v5 = vld [vmem:[%s2828_s2] ss:$0 sm:$0xff]  ;;  %s2321_s5 = smov 56   ;;  %s2322_s27 = smov 80   ;;  %vm974_vm10 = vcmask 130048  }
  0x19   :  { %s2323_s28 = smov 112   ;;  %s2324_s7 = smov 72   ;;  %v288_v45 = vld [vmem:[#allocation2] sm:$0xf] }
  0x1a   :  { %s2325_s29 = smov 48   ;;  %v446_v46 = vsel %vm424_vm2, %v288_v45, 0  ;;  %s2327_s30 = smov 40  }
  0x1b   :  { %151 = vmatpush.bf16.msra.mxu0 %v1982_v1 }
  0x1e   :  { %1857 = vmatmul.msk.bf16.vlgmr.msra.gmra.mxu0 %vm140_vm0, %v121_v4 }
  0x1f   :  { %455 = vmatpush.bf16.msrb.mxu0 %v446_v46 }
  0x9b   :  { %v153_v6 = vpop.f32.mrf.mxu0 }
  0x9c   :  { %v2434_v7 = vadd.f32 %v2064_v5, %v153_v6 }
  0x9e   :  { %291 = vrot.lane.b32.xlu1 %v2434_v7, %s2318_s25  ;;  %159 = vrot.lane.b32.xlu0 %v2434_v7, %s2319_s1 }
  0xa3   :  { %v155_v8 = vpop.f32.mrf.mxu0 }
  0xa4   :  { %v2440_v9 = vadd.f32 %v2064_v5, %v155_v8 }
  0xa6   :  { %289 = vrot.lane.b32.xlu1 %v2434_v7, %s2320_s26  ;;  %187 = vrot.lane.b32.xlu0 %v2440_v9, %s2319_s1 }
  0xae   :  { %231 = vrot.lane.b32.xlu0 %v2434_v7, %s2312_s21 }
  0xb6   :  { %363 = vrot.lane.b32.xlu0 %v2434_v7, %s2321_s5 }
  0xbe   :  { %319 = vrot.lane.b32.xlu0 %v2440_v9, %s2318_s25 }
  0xc6   :  { %464 = vrot.lane.b32.xlu0 %v2434_v7, %s2322_s27 }
  0xce   :  { %462 = vrot.lane.b32.xlu0 %v2434_v7, %s2323_s28 }
  0xd6   :  { %492 = vrot.lane.b32.xlu0 %v2440_v9, %s2322_s27 }
 0x110   :  { %v292_v10 = vpop.permute.xlu1 %291  ;;  %v160_v11 = vpop.permute.xlu0 %159 }
 0x111   :  { %1858 = vmatpush.xpose.msk.msra.mxu1 %vm161_vm1, %v160_v11 }
 0x114   :  { %1859 = vmatmul.msk.f32.vlgmr.msra.gmra.mxu1 %vm161_vm1, %v2434_v7 }
 0x115   :  { %1864 = vmatpush.xpose.msk.msrb.mxu1 %vm161_vm1, %v292_v10 }
 0x118   :  { %v188_v12 = vpop.permute.xlu0 %187  ;;  %v290_v13 = vpop.permute.xlu1 %289 }
 0x119   :  { %1860 = vmatpush.xpose.msk.msra.mxu2 %vm161_vm1, %v188_v12 }
 0x11c   :  { %1861 = vmatmul.msk.f32.vlgmr.msra.gmra.mxu2 %vm161_vm1, %v2440_v9  ;;  %1865 = vmatmul.msk.f32.vlgmr.msrb.gmra.mxu1 %vm161_vm1, %v290_v13 }
 0x120   :  { %v232_v14 = vpop.permute.xlu0 %231 }
 0x121   :  { %252 = vmatpush.msra.mxu3 %v232_v14 }
 0x128   :  { %v364_v15 = vpop.permute.xlu0 %363 }
 0x130   :  { %v320_v16 = vpop.permute.xlu0 %319 }
 0x131   :  { %1866 = vmatpush.xpose.msk.msrb.mxu2 %vm161_vm1, %v320_v16 }
 0x138   :  { %v465_v28 = vpop.permute.xlu0 %464 }
 0x140   :  { %v463_v30 = vpop.permute.xlu0 %462 }
 0x148   :  { %v493_v33 = vpop.permute.xlu0 %492 }
 0x191   :  { %v183_v17 = vpop.f32.mrf.mxu1 }
 0x192   :  { %v213_v18 = vsel %vm161_vm1, %v183_v17, -inf }
 0x193   :  { %214 = vmax.xlane.f32.xlu2 %v213_v18 }
 0x199   :  { %v314_v19 = vpop.f32.mrf.mxu1 }
 0x19a   :  { %v345_v20 = vsel %vm161_vm1, %v314_v19, -inf }
 0x19b   :  { %346 = vmax.xlane.f32.xlu1 %v345_v20 }
 0x19f   :  { %v210_v21 = vpop.f32.mrf.mxu2 }
 0x1a0   :  { %v216_v22 = vsel %vm161_vm1, %v210_v21, -inf }
 0x1ab   :  { %257 = vrot.lane.b32.xlu2 %v2440_v9, %s2312_s21  ;;  %s2326_s21 = smov 104  }
 0x1b4   :  { %389 = vrot.lane.b32.xlu1 %v2440_v9, %s2321_s5 }
 0x1bc   :  { %646 = vrot.lane.b32.xlu1 %v2440_v9, %s2324_s7 }
 0x1c4   :  { %490 = vrot.lane.b32.xlu1 %v2440_v9, %s2323_s28 }
 0x1d4   :  { %217 = vmax.xlane.f32.xlu2 %v216_v22 }
 0x1ec   :  { %317 = vrot.lane.b32.xlu2 %v2440_v9, %s2320_s26 }
 0x1f4   :  { %536 = vrot.lane.b32.xlu2 %v2434_v7, %s2325_s29 }
 0x206   :  { %v215_v23 = vpop.xlane.xlu2 %214 }
 0x207   :  { %v219_v24 = vsub.f32 %v183_v17, %v215_v23 }
 0x209   :  { %v221_v25 = vmul.f32 1.442695, %v219_v24 }
 0x20b   :  { %2077 = vpow2.f32 %v221_v25 }
 0x20e   :  { %v258_v26 = vpop.permute.xlu2 %257  ;;  %v347_v31 = vpop.xlane.xlu1 %346 }
 0x20f   :  { %278 = vmatpush.msrb.mxu3 %v258_v26  ;;  %v351_v37 = vsub.f32 %v314_v19, %v347_v31  ;;  %v2019_v26 = vpack.i.bf16 %v2440_v9, %v2434_v7 }
 0x211   :  { %v2078_v27 = vpop.eup %2077  ;;  %v353_v39 = vmul.f32 1.442695, %v351_v37 }
 0x212   :  { %1862 = vmatmul.msk.f32.vlgmr.msra.gmra.mxu3 %vm161_vm1, %v2078_v27  ;;  %v225_v29 = vsel %vm161_vm1, %v2078_v27, 0.0 }
 0x213   :  { %384 = vmatpush.msra.mxu3 %v364_v15 }
 0x21d   :  { %226 = vadd.xlane.f32.xlu2 %v225_v29 }
 0x226   :  { %v390_v32 = vpop.permute.xlu1 %389 }
 0x227   :  { %410 = vmatpush.msra.mxu1 %v390_v32 }
 0x229   :  { %1874 = vmatpush.xpose.msk.msrb.mxu1 %vm161_vm1, %v493_v33  ;;  %v420_v33 = vld [vmem:[#allocation2 + $0x4] sm:$0xf] }
 0x22e   :  { %v647_v44 = vpop.permute.xlu1 %646 }
 0x235   :  { %644 = vrot.lane.b32.xlu2 %v2440_v9, %s2326_s21 }
 0x236   :  { %v491_v61 = vpop.permute.xlu1 %490 }
 0x247   :  { %v218_v34 = vpop.xlane.xlu2 %217 }
 0x248   :  { %v220_v35 = vsub.f32 %v210_v21, %v218_v34  ;;  %v426_v34 = vsel %vm424_vm2, %v420_v33, 0 }
 0x249   :  { %435 = vmatpush.bf16.msra.mxu2 %v426_v34 }
 0x24a   :  { %v223_v36 = vmul.f32 1.442695, %v220_v35 }
 0x24c   :  { %2079 = vpow2.f32 %v223_v36 }
 0x24d   :  { %2081 = vpow2.f32 %v353_v39 }
 0x24f   :  { %v318_v38 = vpop.permute.xlu2 %317 }
 0x250   :  { %1867 = vmatmul.msk.f32.vlgmr.msrb.gmra.mxu2 %vm161_vm1, %v318_v38 }
 0x252   :  { %v2080_v40 = vpop.eup %2079 }
 0x253   :  { %1863 = vmatmul.msk.f32.vlgmr.msrb.gmra.mxu3 %vm161_vm1, %v2080_v40  ;;  %v228_v41 = vsel %vm161_vm1, %v2080_v40, 0.0  ;;  %v2491_v42 = vpop.eup %2081 }
 0x254   :  { %1872 = vmatpush.xpose.msk.msrb.mxu3 %vm161_vm1, %v465_v28  ;;  %229 = vadd.xlane.f32.xlu0 %v228_v41  ;;  %v357_v23 = vsel %vm161_vm1, %v2491_v42, 0.0 }
 0x257   :  { %v537_v43 = vpop.permute.xlu2 %536 }
 0x25b   :  { %1868 = vmatmul.msk.f32.vlgmr.msra.gmra.mxu3 %vm161_vm1, %v2491_v42 }
 0x25c   :  { %557 = vmatpush.msra.mxu3 %v537_v43 }
 0x263   :  { %1873 = vmatmul.msk.f32.vlgmr.msrb.gmra.mxu3 %vm161_vm1, %v463_v30 }
 0x264   :  { %1881 = vmatpush.xpose.msk.msrb.mxu3 %vm161_vm1, %v647_v44 }
 0x268   :  { %616 = vrot.lane.b32.xlu0 %v2434_v7, %s2326_s21 }
 0x290   :  { %v227_v47 = vpop.xlane.xlu2 %226 }
 0x291   :  { %2083 = vrcp.f32 %v227_v47 }
 0x295   :  { %v254_v49 = vpop.f32.mrf.mxu3 }
 0x297   :  { %v2084_v51 = vpop.eup %2083 }
 0x298   :  { %v285_v55 = vmul.f32 %v2084_v51, %v254_v49  ;;  %v645_v10 = vpop.permute.xlu2 %644 }
 0x2c7   :  { %v230_v48 = vpop.xlane.xlu0 %229 }
 0x2c8   :  { %2085 = vrcp.f32 %v230_v48 }
 0x2ce   :  { %v2086_v53 = vpop.eup %2085 }
 0x2d3   :  { %v342_v50 = vpop.f32.mrf.mxu2 }
 0x2d4   :  { %v348_v52 = vsel %vm161_vm1, %v342_v50, -inf }
 0x2d5   :  { %349 = vmax.xlane.f32.xlu1 %v348_v52 }
 0x2d6   :  { %v280_v54 = vpop.f32.mrf.mxu3 }
 0x2d7   :  { %v286_v56 = vmul.f32 %v2086_v53, %v280_v54  ;;  %v593_v53 = vld [vmem:[#allocation2 + $0x8] sm:$0xf] }
 0x2d8   :  { %v598_v54 = vsel %vm424_vm2, %v593_v53, 0 }
 0x2d9   :  { %v287_v57 = vpack.c.bf16 %v286_v56, %v285_v55  ;;  %607 = vmatpush.bf16.msrb.mxu2 %v598_v54 }
 0x2da   :  { %v617_v12 = vpop.permute.xlu0 %616 }
 0x2db   :  { %1871 = vmatmul.msk.bf16.vlgmr.msrb.gmra.mxu0 %vm161_vm1, %v287_v57 }
 0x2de   :  { %v2502_v58 = vpop.f32.mrf.mxu3 }
 0x2e6   :  { %v487_v59 = vpop.f32.mrf.mxu3 }
 0x2e7   :  { %v518_v60 = vsel %vm161_vm1, %v487_v59, -inf }
 0x2e8   :  { %519 = vmax.xlane.f32.xlu1 %v518_v60 }
 0x301   :  { %618 = vrot.lane.b32.xlu1 %v2434_v7, %s2324_s7 }
 0x348   :  { %v350_v62 = vpop.xlane.xlu1 %349 }
 0x349   :  { %v352_v63 = vsub.f32 %v342_v50, %v350_v62 }
 0x34b   :  { %v355_v0 = vmul.f32 1.442695, %v352_v63  ;;  %v747_v63 = vld [vmem:[#allocation2 + $0xc] sm:$0xf] }
 0x34d   :  { %2087 = vpow2.f32 %v355_v0  ;;  %v752_v0 = vsel %vm424_vm2, %v747_v63, 0 }
 0x353   :  { %v2088_v1 = vpop.eup %2087 }
 0x354   :  { %1869 = vmatmul.msk.f32.vlgmr.msra.gmra.mxu1 %vm161_vm1, %v2088_v1  ;;  %v360_v24 = vsel %vm161_vm1, %v2088_v1, 0.0 }
 0x358   :  { %v2514_v16 = vpop.f32.mrf.mxu0 }
 0x35b   :  { %v520_v4 = vpop.xlane.xlu1 %519 }
 0x35c   :  { %v524_v5 = vsub.f32 %v487_v59, %v520_v4  ;;  %1875 = vmatmul.msk.f32.vlgmr.msrb.gmra.mxu1 %vm161_vm1, %v491_v61 }
 0x35e   :  { %v526_v6 = vmul.f32 1.442695, %v524_v5 }
 0x360   :  { %2089 = vpow2.f32 %v526_v6  ;;  %v2518_v18 = vpop.f32.mrf.mxu0 }
 0x366   :  { %v2090_v8 = vpop.eup %2089 }
 0x367   :  { %1876 = vmatmul.msk.f32.vlgmr.msra.gmra.mxu3 %vm161_vm1, %v2090_v8  ;;  %v530_v25 = vsel %vm161_vm1, %v2090_v8, 0.0 }
 0x36f   :  { %1882 = vmatmul.msk.f32.vlgmr.msrb.gmra.mxu3 %vm161_vm1, %v645_v10 }
 0x373   :  { %v619_v11 = vpop.permute.xlu1 %618 }
 0x374   :  { %1879 = vmatpush.xpose.msk.msra.mxu0 %vm161_vm1, %v619_v11 }
 0x377   :  { %1880 = vmatmul.msk.f32.vlgmr.msra.gmra.mxu0 %vm161_vm1, %v617_v12 }
 0x3d1   :  { %v412_v13 = vpop.f32.mrf.mxu1 }
 0x3d9   :  { %v515_v14 = vpop.f32.mrf.mxu1 }
 0x3da   :  { %v521_v15 = vsel %vm161_vm1, %v515_v14, -inf }
 0x3db   :  { %522 = vmax.xlane.f32.xlu2 %v521_v15 }
 0x3ea   :  { %v2516_v17 = vpop.f32.mrf.mxu3 }
 0x3f2   :  { %v669_v19 = vpop.f32.mrf.mxu3 }
 0x3f3   :  { %562 = vrot.lane.b32.xlu2 %v2440_v9, %s2325_s29  ;;  %v675_v20 = vsel %vm161_vm1, %v669_v19, -inf }
 0x3f4   :  { %676 = vmax.xlane.f32.xlu0 %v675_v20  ;;  %v641_v21 = vpop.f32.mrf.mxu0 }
 0x3f5   :  { %v672_v22 = vsel %vm161_vm1, %v641_v21, -inf }
 0x3f6   :  { %673 = vmax.xlane.f32.xlu1 %v672_v22 }
 0x3fc   :  { %358 = vadd.xlane.f32.xlu0 %v357_v23 }
 0x404   :  { %361 = vadd.xlane.f32.xlu0 %v360_v24 }
 0x40c   :  { %531 = vadd.xlane.f32.xlu0 %v530_v25 }
 0x40f   :  { %2020 = vrot.lane.b32.xlu1 %v2019_v26, %s2327_s30 }
 0x44e   :  { %v523_v27 = vpop.xlane.xlu2 %522 }
 0x44f   :  { %v525_v28 = vsub.f32 %v515_v14, %v523_v27 }
 0x451   :  { %v528_v29 = vmul.f32 1.442695, %v525_v28 }
 0x453   :  { %2091 = vpow2.f32 %v528_v29 }
 0x456   :  { %v563_v30 = vpop.permute.xlu2 %562 }
 0x457   :  { %583 = vmatpush.msra.mxu1 %v563_v30 }
 0x459   :  { %v2092_v31 = vpop.eup %2091 }
 0x45a   :  { %1877 = vmatmul.msk.f32.vlgmr.msra.gmra.mxu1 %vm161_vm1, %v2092_v31  ;;  %v533_v32 = vsel %vm161_vm1, %v2092_v31, 0.0 }
 0x45b   :  { %534 = vadd.xlane.f32.xlu2 %v533_v32  ;;  %v2328_v32 = vmov 32.0  }
 0x467   :  { %v677_v35 = vpop.xlane.xlu0 %676 }
 0x468   :  { %v679_v7 = vsub.f32 %v669_v19, %v677_v35  ;;  %v1987_v35 = vld [vmem:[#allocation7 + $0x8] sm:$0xff] }
 0x469   :  { %v674_v9 = vpop.xlane.xlu1 %673 }
 0x46a   :  { %v682_v36 = vmul.f32 1.442695, %v679_v7  ;;  %v678_v37 = vsub.f32 %v641_v21, %v674_v9  ;;  %v2065_v21 = vld [vmem:[%s2828_s2 + $0x1] ss:$0 sm:$0xff] }
 0x46c   :  { %2093 = vpow2.f32 %v682_v36  ;;  %v680_v38 = vmul.f32 1.442695, %v678_v37 }
 0x46e   :  { %2095 = vpow2.f32 %v680_v38 }
 0x46f   :  { %v359_v39 = vpop.xlane.xlu0 %358 }
 0x470   :  { %2097 = vrcp.f32 %v359_v39 }
 0x472   :  { %v2094_v40 = vpop.eup %2093 }
 0x473   :  { %v687_v41 = vsel %vm161_vm1, %v2094_v40, 0.0 }
 0x474   :  { %v2096_v42 = vpop.eup %2095  ;;  %688 = vadd.xlane.f32.xlu0 %v687_v41 }
 0x475   :  { %v684_v43 = vsel %vm161_vm1, %v2096_v42, 0.0 }
 0x476   :  { %685 = vadd.xlane.f32.xlu1 %v684_v43  ;;  %v2098_v45 = vpop.eup %2097 }
 0x477   :  { %v362_v44 = vpop.xlane.xlu0 %361  ;;  %v417_v47 = vmul.f32 %v2098_v45, %v2502_v58 }
 0x478   :  { %2099 = vrcp.f32 %v362_v44 }
 0x47e   :  { %v2100_v46 = vpop.eup %2099 }
 0x47f   :  { %v418_v48 = vmul.f32 %v2100_v46, %v412_v13  ;;  %v532_v55 = vpop.xlane.xlu0 %531 }
 0x480   :  { %2101 = vrcp.f32 %v532_v55 }
 0x481   :  { %v419_v49 = vpack.c.bf16 %v418_v48, %v417_v47  ;;  %v2021_v50 = vpop.permute.xlu1 %2020  ;;  %v1986_v47 = vld [vmem:[#allocation7] sm:$0xff] }
 0x482   :  { %v2023_v51 = vunpack.i.h.bf16 %v2021_v50  ;;  %v2022_v52 = vunpack.i.l.bf16 %v2021_v50  ;;  %v117_v48 = vld [vmem:[%s2826_s0] sm:$0xff] }
 0x483   :  { %1870 = vmatmul.msk.bf16.vlgmr.msra.gmra.mxu2 %vm161_vm1, %v419_v49  ;;  %v118_v49 = vld [vmem:[%s2826_s0 + $0x8] sm:$0xff] }
 0x484   :  { %711 = vmatpush.msrb.mxu1 %v2022_v52  ;;  %737 = vmatpush.msrb.mxu0 %v2023_v51  ;;  %v871_v50 = vpack.c.bf16 %v118_v49, %v117_v48  ;;  %v119_v51 = vld [vmem:[%s2826_s0 + $0x10] sm:$0xff]  ;;  %v120_v52 = vld [vmem:[%s2826_s0 + $0x18] sm:$0xff] }
 0x485   :  { %1883 = vmatmul.msk.f32.vlgmr.msrb.gmra.mxu1 %vm161_vm1, %v2096_v42  ;;  %1884 = vmatmul.msk.f32.vlgmr.msrb.gmra.mxu0 %vm161_vm1, %v2094_v40  ;;  %v872_v53 = vpack.c.bf16 %v120_v52, %v119_v51 }
 0x486   :  { %v2102_v57 = vpop.eup %2101  ;;  %761 = vmatpush.bf16.msra.mxu1 %v752_v0  ;;  %903 = vmatpush.bf16.msra.mxu2 %v1987_v35 }
 0x487   :  { %v590_v60 = vmul.f32 %v2102_v57, %v2516_v17 }
 0x48a   :  { %904 = vmatpush.bf16.msra.mxu2 %v1986_v47 }
 0x4ce   :  { %v535_v56 = vpop.xlane.xlu2 %534 }
 0x4cf   :  { %2103 = vrcp.f32 %v535_v56  ;;  %v1985_v56 = vld [vmem:[#allocation5 + $0x8] sm:$0xff] }
 0x4d0   :  { %863 = vmatpush.bf16.msrb.mxu1 %v1985_v56 }
 0x4d5   :  { %v2104_v58 = vpop.eup %2103 }
 0x4d7   :  { %v585_v59 = vpop.f32.mrf.mxu1 }
 0x4d8   :  { %v591_v61 = vmul.f32 %v2104_v58, %v585_v59  ;;  %v1984_v58 = vld [vmem:[#allocation5] sm:$0xff] }
 0x4d9   :  { %864 = vmatpush.bf16.msrb.mxu1 %v1984_v58 }
 0x4da   :  { %v592_v62 = vpack.c.bf16 %v591_v61, %v590_v60 }
 0x4dc   :  { %1878 = vmatmul.msk.bf16.vlgmr.msrb.gmra.mxu2 %vm161_vm1, %v592_v62 }
 0x4e7   :  { %v689_v1 = vpop.xlane.xlu0 %688 }
 0x4e8   :  { %2105 = vrcp.f32 %v689_v1 }
 0x4e9   :  { %v686_v4 = vpop.xlane.xlu1 %685 }
 0x4ea   :  { %2107 = vrcp.f32 %v686_v4 }
 0x4eb   :  { %2109 = vrcp.f32 %v2328_v32 }
 0x4ec   :  { %1903 = vmatmul.msk.bf16.vlgmr.msra.gmra.mxu2 %vm140_vm0, %v871_v50 }
 0x4ee   :  { %v2106_v5 = vpop.eup %2105 }
 0x4f0   :  { %v2108_v6 = vpop.eup %2107 }
 0x4f1   :  { %v2110_v33 = vpop.eup %2109 }
 0x4f2   :  { %v783_v34 = vmul.f32 32.0, %v2110_v33  ;;  %vm787_vm3 = vweird.f32 %v2110_v33 }
 0x4f4   :  { %v784_v7 = vsub.f32 1.0, %v783_v34 }
 0x4f6   :  { %v785_v9 = vmul.f32 %v2110_v33, %v784_v7  ;;  %v2069_v7 = vld [vmem:[%s2828_s2 + $0x2] ss:$0 sm:$0xff] }
 0x4f8   :  { %v786_v36 = vadd.f32 %v2110_v33, %v785_v9 }
 0x4fc   :  { %1904 = vmatmul.msk.bf16.gmra.mxu2 %vm140_vm0, %v872_v53 }
 0x502   :  { %v713_v8 = vpop.f32.mrf.mxu1  ;;  %v739_v10 = vpop.f32.mrf.mxu0 }
 0x503   :  { %v744_v11 = vmul.f32 %v2108_v6, %v713_v8  ;;  %v745_v12 = vmul.f32 %v2106_v5, %v739_v10 }
 0x505   :  { %v746_v13 = vpack.c.bf16 %v745_v12, %v744_v11 }
 0x506   :  { %v437_v14 = vpop.f32.mrf.mxu2 }
 0x507   :  { %1885 = vmatmul.msk.bf16.vlgmr.msra.gmra.mxu1 %vm161_vm1, %v746_v13  ;;  %v458_v19 = vadd.f32 %v2514_v16, %v437_v14  ;;  %v2066_v13 = vld [vmem:[%s2828_s2 + $0x7] ss:$0 sm:$0xff] }
 0x50e   :  { %v439_v15 = vpop.f32.mrf.mxu2 }
 0x50f   :  { %v460_v26 = vadd.f32 %v2518_v18, %v439_v15  ;;  %v2551_v18 = vsel %vm787_vm3, %v2110_v33, %v786_v36 }
 0x55f   :  { %v609_v17 = vpop.f32.mrf.mxu2 }
 0x560   :  { %v614_v20 = vadd.f32 %v609_v17, %v458_v19  ;;  %v2067_v19 = vld [vmem:[%s2828_s2 + $0x8] ss:$0 sm:$0xff] }
 0x567   :  { %v611_v25 = vpop.f32.mrf.mxu2 }
 0x568   :  { %v615_v28 = vadd.f32 %v611_v25, %v460_v26 }
 0x584   :  { %v763_v22 = vpop.f32.mrf.mxu1 }
 0x585   :  { %v768_v23 = vadd.f32 %v763_v22, %v614_v20 }
 0x587   :  { %v772_v24 = vadd.f32 %v2065_v21, %v768_v23 }
 0x589   :  { %v776_v27 = vsel %vm140_vm0, %v772_v24, 0.0 }
 0x58a   :  { %777 = vadd.xlane.f32.xlu0 %v776_v27 }
 0x58c   :  { %v765_v29 = vpop.f32.mrf.mxu1 }
 0x58d   :  { %v769_v30 = vadd.f32 %v765_v29, %v615_v28  ;;  %v906_v29 = vpop.f32.mrf.mxu2 }
 0x58f   :  { %v773_v31 = vadd.f32 %v2065_v21, %v769_v30  ;;  %v2068_v30 = vld [vmem:[%s2828_s2 + $0x3] ss:$0 sm:$0xff] }
 0x591   :  { %v779_v16 = vsel %vm140_vm0, %v773_v31, 0.0 }
 0x592   :  { %780 = vadd.xlane.f32.xlu0 %v779_v16 }
 0x595   :  { %v908_v16 = vpop.f32.mrf.mxu2 }
 0x596   :  { %v2593_v32 = vadd.f32 %v2068_v30, %v908_v16 }
 0x598   :  { %1061 = vrot.lane.b32.xlu1 %v2593_v32, %s2320_s26  ;;  %1905 = vmatpush.xpose.msk.msra.mxu0 %vm161_vm1, %v2593_v32 }
 0x5a0   :  { %1247 = vrot.lane.b32.xlu1 %v2593_v32, %s2323_s28 }
 0x5fd   :  { %v778_v37 = vpop.xlane.xlu0 %777 }
 0x5fe   :  { %v789_v38 = vmul.f32 %v2551_v18, %v778_v37 }
 0x600   :  { %v791_v39 = vsub.f32 %v772_v24, %v789_v38 }
 0x602   :  { %v793_v40 = vmul.f32 %v791_v39, %v791_v39 }
 0x604   :  { %v795_v41 = vsel %vm140_vm0, %v793_v40, 0.0 }
 0x605   :  { %796 = vadd.xlane.f32.xlu0 %v795_v41  ;;  %v781_v42 = vpop.xlane.xlu0 %780 }
 0x606   :  { %v790_v43 = vmul.f32 %v2551_v18, %v781_v42 }
 0x608   :  { %v792_v44 = vsub.f32 %v773_v31, %v790_v43  ;;  %v2591_v31 = vadd.f32 %v2068_v30, %v906_v29 }
 0x60a   :  { %v794_v45 = vmul.f32 %v792_v44, %v792_v44  ;;  %1906 = vmatpush.xpose.msk.msra.mxu0 %vm161_vm1, %v2591_v31  ;;  %1245 = vrot.lane.b32.xlu1 %v2591_v31, %s2323_s28  ;;  %v1062_v40 = vpop.permute.xlu1 %1061 }
 0x60c   :  { %v798_v46 = vsel %vm140_vm0, %v794_v45, 0.0 }
 0x60d   :  { %799 = vadd.xlane.f32.xlu0 %v798_v46 }
 0x678   :  { %v797_v54 = vpop.xlane.xlu0 %796 }
 0x679   :  { %v801_v55 = vmul.f32 %v797_v54, %v2551_v18 }
 0x67b   :  { %v803_v57 = vadd.f32 1e-05, %v801_v55 }
 0x67d   :  { %2111 = vrsqrt.f32 %v803_v57  ;;  %vm811_vm5 = vweird.f32 %v803_v57 }
 0x680   :  { %v800_v59 = vpop.xlane.xlu0 %799 }
 0x681   :  { %v802_v60 = vmul.f32 %v800_v59, %v2551_v18 }
 0x683   :  { %v2112_v61 = vpop.eup %2111  ;;  %v804_v62 = vadd.f32 1e-05, %v802_v60 }
 0x684   :  { %v806_v63 = vmul.f32 %v2112_v61, %v803_v57  ;;  %vm812_vm4 = vweird.f32 %v2112_v61 }
 0x685   :  { %2113 = vrsqrt.f32 %v804_v62  ;;  %vm813_vm6 = vmor %vm811_vm5, %vm812_vm4  ;;  %vm821_vm8 = vweird.f32 %v804_v62 }
 0x686   :  { %v807_v0 = vmul.f32 %v2112_v61, %v806_v63 }
 0x688   :  { %v808_v1 = vmul.f32 0.5, %v807_v0 }
 0x68a   :  { %v809_v4 = vsub.f32 1.5, %v808_v1 }
 0x68b   :  { %v2114_v5 = vpop.eup %2113 }
 0x68c   :  { %v810_v6 = vmul.f32 %v2112_v61, %v809_v4  ;;  %v816_v8 = vmul.f32 %v2114_v5, %v804_v62  ;;  %vm822_vm7 = vweird.f32 %v2114_v5 }
 0x68d   :  { %vm823_vm9 = vmor %vm821_vm8, %vm822_vm7 }
 0x68e   :  { %v814_v10 = vsel %vm813_vm6, %v2112_v61, %v810_v6  ;;  %v817_v11 = vmul.f32 %v2114_v5, %v816_v8 }
 0x68f   :  { %v825_v14 = vmul.f32 %v814_v10, %v791_v39 }
 0x690   :  { %v818_v12 = vmul.f32 0.5, %v817_v11 }
 0x691   :  { %v828_v20 = vmul.f32 %v2066_v13, %v825_v14 }
 0x692   :  { %v819_v15 = vsub.f32 1.5, %v818_v12 }
 0x693   :  { %v831_v23 = vadd.f32 %v2067_v19, %v828_v20 }
 0x694   :  { %v820_v17 = vmul.f32 %v2114_v5, %v819_v15 }
 0x695   :  { %v2580_v26 = vadd.f32 %v831_v23, %v2421_v2  ;;  %v2599_v2 = vpack.i.bf16 %v2591_v31, %v2593_v32 }
 0x696   :  { %v824_v21 = vsel %vm823_vm9, %v2114_v5, %v820_v17 }
 0x697   :  { %v826_v22 = vmul.f32 %v824_v21, %v792_v44  ;;  %2025 = vrot.lane.b32.xlu0 %v2599_v2, %s2319_s1  ;;  %v1248_v44 = vpop.permute.xlu1 %1247 }
 0x698   :  { %1923 = vmatpush.xpose.msk.msrb.mxu2 %vm161_vm1, %v1248_v44 }
 0x699   :  { %v829_v24 = vmul.f32 %v2066_v13, %v826_v22 }
 0x69b   :  { %v832_v25 = vadd.f32 %v2067_v19, %v829_v24 }
 0x69d   :  { %v2583_v27 = vadd.f32 %v832_v25, %v2426_v3  ;;  %v911_v3 = vpop.f32.mrf.mxu2 }
 0x69e   :  { %v2619_v35 = vadd.f32 %v2068_v30, %v911_v3 }
 0x69f   :  { %v835_v28 = vpack.c.bf16 %v2583_v27, %v2580_v26  ;;  %1059 = vrot.lane.b32.xlu0 %v2591_v31, %s2320_s26  ;;  %v1246_v46 = vpop.permute.xlu1 %1245 }
 0x6a0   :  { %1924 = vmatpush.xpose.msk.msrb.mxu2 %vm161_vm1, %v1246_v46 }
 0x6a1   :  { %1894 = vmatmul.msk.bf16.vlgmr.msrb.gmra.mxu1 %vm140_vm0, %v835_v28 }
 0x6a5   :  { %v913_v33 = vpop.f32.mrf.mxu2 }
 0x6a6   :  { %v2611_v34 = vadd.f32 %v2068_v30, %v913_v33  ;;  %v1056_v30 = vld [vmem:[#allocation8] sm:$0xf] }
 0x6a7   :  { %v1227_v16 = vsel %vm424_vm2, %v1056_v30, 0 }
 0x6a8   :  { %1908 = vmatpush.xpose.msk.msrb.mxu0 %vm161_vm1, %v2611_v34  ;;  %1093 = vrot.lane.b32.xlu2 %v2611_v34, %s2320_s26  ;;  %v2642_v39 = vpack.i.bf16 %v2619_v35, %v2611_v34 }
 0x6ac   :  { %1909 = vmatpush.xpose.msk.msrb.mxu0 %vm161_vm1, %v2619_v35 }
 0x6b0   :  { %1091 = vrot.lane.b32.xlu2 %v2619_v35, %s2320_s26 }
 0x702   :  { %v1094_v48 = vpop.permute.xlu2 %1093 }
 0x709   :  { %v2026_v41 = vpop.permute.xlu0 %2025 }
 0x70a   :  { %v2028_v42 = vunpack.i.h.bf16 %v2026_v41  ;;  %v2027_v43 = vunpack.i.l.bf16 %v2026_v41  ;;  %v1092_v52 = vpop.permute.xlu2 %1091 }
 0x70c   :  { %1016 = vmatpush.msra.mxu3 %v2027_v43 }
 0x70e   :  { %1017 = vmatpush.msra.mxu3 %v2028_v42 }
 0x710   :  { %1916 = vmatpush.xpose.msk.msrb.mxu3 %vm161_vm1, %v1094_v48 }
 0x711   :  { %v1060_v45 = vpop.permute.xlu0 %1059 }
 0x714   :  { %1917 = vmatpush.xpose.msk.msrb.mxu3 %vm161_vm1, %v1092_v52 }
 0x71e   :  { %v866_v9 = vpop.f32.mrf.mxu1 }
 0x71f   :  { %v2628_v36 = vadd.f32 %v2069_v7, %v866_v9 }
 0x721   :  { %1057 = vrot.lane.b32.xlu0 %v2628_v36, %s2320_s26  ;;  %1907 = vmatmul.msk.f32.vlgmr.msra.gmra.mxu0 %vm161_vm1, %v2628_v36 }
 0x722   :  { %1913 = vmatpush.xpose.msk.msra.mxu0 %vm161_vm1, %v1062_v40 }
 0x726   :  { %v868_v37 = vpop.f32.mrf.mxu1  ;;  %1914 = vmatpush.xpose.msk.msra.mxu0 %vm161_vm1, %v1060_v45 }
 0x727   :  { %v2634_v38 = vadd.f32 %v2069_v7, %v868_v37 }
 0x729   :  { %1243 = vrot.lane.b32.xlu0 %v2628_v36, %s2323_s28  ;;  %1910 = vmatmul.msk.f32.vlgmr.msrb.gmra.mxu0 %vm161_vm1, %v2634_v38 }
 0x731   :  { %2040 = vrot.lane.b32.xlu0 %v2642_v39, %s2318_s25 }
 0x739   :  { %1279 = vrot.lane.b32.xlu0 %v2611_v34, %s2323_s28 }
 0x741   :  { %1277 = vrot.lane.b32.xlu0 %v2619_v35, %s2323_s28 }
 0x749   :  { %1415 = vrot.lane.b32.xlu0 %v2593_v32, %s2326_s21 }
 0x793   :  { %v1058_v47 = vpop.permute.xlu0 %1057 }
 0x794   :  { %1915 = vmatmul.msk.f32.vlgmr.msra.gmra.mxu0 %vm161_vm1, %v1058_v47 }
 0x79b   :  { %v1244_v49 = vpop.permute.xlu0 %1243 }
 0x79c   :  { %1925 = vmatmul.msk.f32.vlgmr.msrb.gmra.mxu2 %vm161_vm1, %v1244_v49 }
 0x79e   :  { %v942_v50 = vpop.f32.mrf.mxu0 }
 0x79f   :  { %v975_v51 = vsel %vm974_vm10, %v942_v50, -inf }
 0x7a0   :  { %976 = vmax.xlane.f32.xlu2 %v975_v51 }
 0x7a3   :  { %v2041_v53 = vpop.permute.xlu0 %2040 }
 0x7a4   :  { %v2043_v54 = vunpack.i.h.bf16 %v2041_v53  ;;  %v2042_v55 = vunpack.i.l.bf16 %v2041_v53 }
 0x7a6   :  { %v971_v56 = vpop.f32.mrf.mxu0  ;;  %1191 = vmatpush.msrb.mxu0 %v2042_v55 }
 0x7a7   :  { %v978_v57 = vsel %vm974_vm10, %v971_v56, -inf }
 0x7a8   :  { %979 = vmax.xlane.f32.xlu1 %v978_v57  ;;  %1192 = vmatpush.msrb.mxu0 %v2043_v54 }
 0x7ab   :  { %v1280_v58 = vpop.permute.xlu0 %1279 }
 0x7ac   :  { %1926 = vmatpush.xpose.msk.msra.mxu0 %vm161_vm1, %v1280_v58 }
 0x7b3   :  { %v1278_v59 = vpop.permute.xlu0 %1277 }
 0x7b4   :  { %1927 = vmatpush.xpose.msk.msra.mxu0 %vm161_vm1, %v1278_v59 }
 0x7b8   :  { %1089 = vrot.lane.b32.xlu2 %v2634_v38, %s2320_s26 }
 0x7c0   :  { %2030 = vrot.lane.b32.xlu2 %v2642_v39, %s2319_s1  ;;  %s2329_s1 = smov [#allocation11]  }
 0x7c1   :  { %2035 = vrot.lane.b32.xlu1 %v2599_v2, %s2318_s25  ;;  %s1832_s26 = sshll.u32 %s2329_s1, 4  ;;  %s1833_s26 = int_to_ptr.vmem [resolvable:$true] %s1832_s26 }
 0x7c8   :  { %2045 = vrot.lane.b32.xlu2 %v2599_v2, %s2322_s27  ;;  %v1416_v2 = vpop.permute.xlu0 %1415 }
 0x7c9   :  { %1447 = vrot.lane.b32.xlu1 %v2611_v34, %s2326_s21 }
 0x7d0   :  { %1275 = vrot.lane.b32.xlu2 %v2634_v38, %s2323_s28  ;;  %s2330_s28 = smov 128  }
 0x7d1   :  { %1445 = vrot.lane.b32.xlu1 %v2619_v35, %s2326_s21 }
 0x811   :  { %v1086_v60 = vpop.f32.mrf.mxu0 }
 0x812   :  { %v1121_v61 = vsel %vm974_vm10, %v1086_v60, -inf }
 0x813   :  { %v977_v62 = vpop.xlane.xlu2 %976  ;;  %1122 = vmax.xlane.f32.xlu0 %v1121_v61 }
 0x814   :  { %v981_v63 = vsub.f32 %v942_v50, %v977_v62 }
 0x816   :  { %v983_v0 = vmul.f32 1.442695, %v981_v63 }
 0x818   :  { %2115 = vpow2.f32 %v983_v0 }
 0x81b   :  { %v1090_v1 = vpop.permute.xlu2 %1089  ;;  %v980_v4 = vpop.xlane.xlu1 %979 }
 0x81c   :  { %v982_v5 = vsub.f32 %v971_v56, %v980_v4 }
 0x81e   :  { %v2116_v6 = vpop.eup %2115  ;;  %v985_v8 = vmul.f32 1.442695, %v982_v5 }
 0x81f   :  { %1911 = vmatmul.msk.f32.vlgmr.msra.gmra.mxu3 %vm974_vm10, %v2116_v6  ;;  %v1272_v10 = vpop.f32.mrf.mxu2  ;;  %v987_v19 = vsel %vm974_vm10, %v2116_v6, 0.0 }
 0x820   :  { %2117 = vpow2.f32 %v985_v8  ;;  %v1307_v11 = vsel %vm974_vm10, %v1272_v10, -inf }
 0x821   :  { %1308 = vmax.xlane.f32.xlu2 %v1307_v11 }
 0x823   :  { %v2031_v12 = vpop.permute.xlu2 %2030 }
 0x824   :  { %v2032_v13 = vunpack.i.l.bf16 %v2031_v12  ;;  %v2033_v15 = vunpack.i.h.bf16 %v2031_v12 }
 0x826   :  { %v2118_v14 = vpop.eup %2117  ;;  %1045 = vmatpush.msra.mxu1 %v2032_v13 }
 0x827   :  { %1918 = vmatmul.msk.f32.vlgmr.msrb.gmra.mxu3 %vm161_vm1, %v1090_v1  ;;  %v990_v17 = vsel %vm974_vm10, %v2118_v14, 0.0 }
 0x828   :  { %1046 = vmatpush.msra.mxu1 %v2033_v15  ;;  %991 = vadd.xlane.f32.xlu1 %v990_v17  ;;  %v2054_v17 = vpack.i.bf16 %v2611_v34, %v2593_v32 }
 0x829   :  { %1912 = vmatmul.msk.f32.vlgmr.msra.gmra.mxu1 %vm974_vm10, %v2118_v14  ;;  %988 = vadd.xlane.f32.xlu2 %v987_v19 }
 0x82b   :  { %v2046_v20 = vpop.permute.xlu2 %2045 }
 0x82c   :  { %v2047_v21 = vunpack.i.l.bf16 %v2046_v20  ;;  %v2048_v22 = vunpack.i.h.bf16 %v2046_v20 }
 0x82e   :  { %1348 = vmatpush.msra.mxu2 %v2047_v21 }
 0x830   :  { %1349 = vmatpush.msra.mxu2 %v2048_v22 }
 0x833   :  { %v2036_v23 = vpop.permute.xlu1 %2035  ;;  %v1276_v9 = vpop.permute.xlu2 %1275 }
 0x834   :  { %v2037_v24 = vunpack.i.l.bf16 %v2036_v23  ;;  %v2038_v25 = vunpack.i.h.bf16 %v2036_v23 }
 0x836   :  { %1162 = vmatpush.msrb.mxu1 %v2037_v24 }
 0x838   :  { %1163 = vmatpush.msrb.mxu1 %v2038_v25 }
 0x83a   :  { %1236 = vmatpush.bf16.msra.mxu1 %v1227_v16 }
 0x83b   :  { %v1448_v28 = vpop.permute.xlu1 %1447 }
 0x83c   :  { %1935 = vmatpush.xpose.msk.msrb.mxu2 %vm161_vm1, %v1448_v28 }
 0x841   :  { %1443 = vrot.lane.b32.xlu1 %v2634_v38, %s2326_s21  ;;  %1413 = vrot.lane.b32.xlu2 %v2591_v31, %s2326_s21 }
 0x843   :  { %v1446_v29 = vpop.permute.xlu1 %1445 }
 0x844   :  { %1936 = vmatpush.xpose.msk.msrb.mxu2 %vm161_vm1, %v1446_v29 }
 0x886   :  { %v1123_v3 = vpop.xlane.xlu0 %1122 }
 0x887   :  { %v1127_v33 = vsub.f32 %v1086_v60, %v1123_v3 }
 0x889   :  { %v1129_v7 = vmul.f32 1.442695, %v1127_v33 }
 0x88b   :  { %2119 = vpow2.f32 %v1129_v7 }
 0x891   :  { %v2692_v37 = vpop.eup %2119 }
 0x892   :  { %1919 = vmatmul.msk.f32.vlgmr.msrb.gmra.mxu1 %vm974_vm10, %v2692_v37  ;;  %v1133_v19 = vsel %vm974_vm10, %v2692_v37, 0.0 }
 0x893   :  { %1932 = vmatpush.xpose.msk.msrb.mxu1 %vm161_vm1, %v1416_v2 }
 0x894   :  { %v1309_v38 = vpop.xlane.xlu2 %1308 }
 0x895   :  { %v1313_v40 = vsub.f32 %v1272_v10, %v1309_v38 }
 0x897   :  { %v1315_v41 = vmul.f32 1.442695, %v1313_v40  ;;  %v1202_v40 = vld [vmem:[#allocation8 + $0x4] sm:$0xf] }
 0x899   :  { %2121 = vpow2.f32 %v1315_v41  ;;  %v1207_v41 = vsel %vm424_vm2, %v1202_v40, 0  ;;  %v1988_v40 = vld [vmem:[#allocation10] sm:$0xff] }
 0x89a   :  { %1216 = vmatpush.bf16.msra.mxu3 %v1207_v41 }
 0x89b   :  { %v992_v43 = vpop.xlane.xlu1 %991 }
 0x89c   :  { %v989_v42 = vpop.xlane.xlu2 %988 }
 0x89d   :  { %2123 = vrcp.f32 %v989_v42 }
 0x89e   :  { %2125 = vrcp.f32 %v992_v43 }
 0x89f   :  { %v2122_v44 = vpop.eup %2121 }
 0x8a0   :  { %1929 = vmatmul.msk.f32.vlgmr.msra.gmra.mxu2 %vm974_vm10, %v2122_v44  ;;  %v1319_v0 = vsel %vm974_vm10, %v2122_v44, 0.0 }
 0x8a2   :  { %v1019_v45 = vpop.f32.mrf.mxu3 }
 0x8a3   :  { %v2124_v46 = vpop.eup %2123 }
 0x8a4   :  { %v1414_v47 = vpop.permute.xlu2 %1413  ;;  %v2126_v48 = vpop.eup %2125  ;;  %v1053_v50 = vmul.f32 %v2124_v46, %v1019_v45 }
 0x8a5   :  { %1933 = vmatpush.xpose.msk.msrb.mxu1 %vm161_vm1, %v1414_v47 }
 0x8a6   :  { %v1048_v49 = vpop.f32.mrf.mxu1 }
 0x8a7   :  { %v1054_v51 = vmul.f32 %v2126_v48, %v1048_v49  ;;  %v1388_v49 = vld [vmem:[#allocation8 + $0x8] sm:$0xf] }
 0x8a9   :  { %v1055_v52 = vpack.c.bf16 %v1054_v51, %v1053_v50  ;;  %v1393_v50 = vsel %vm424_vm2, %v1388_v49, 0  ;;  %v1556_v51 = vld [vmem:[#allocation8 + $0xc] sm:$0xf] }
 0x8aa   :  { %v1118_v53 = vpop.f32.mrf.mxu3  ;;  %1402 = vmatpush.bf16.msrb.mxu3 %v1393_v50 }
 0x8ab   :  { %1922 = vmatmul.msk.bf16.vlgmr.msra.gmra.mxu1 %vm161_vm1, %v1055_v52  ;;  %v1124_v54 = vsel %vm974_vm10, %v1118_v53, -inf  ;;  %v1561_v52 = vsel %vm424_vm2, %v1556_v51, 0 }
 0x8ac   :  { %1125 = vmax.xlane.f32.xlu0 %v1124_v54  ;;  %1570 = vmatpush.bf16.msra.mxu2 %v1561_v52 }
 0x8b3   :  { %v1444_v55 = vpop.permute.xlu1 %1443 }
 0x8b4   :  { %1937 = vmatmul.msk.f32.vlgmr.msrb.gmra.mxu2 %vm161_vm1, %v1444_v55 }
 0x8c0   :  { %1411 = vrot.lane.b32.xlu0 %v2628_v36, %s2326_s21  ;;  %v2059_v36 = vpack.i.bf16 %v2619_v35, %v2591_v31 }
 0x90f   :  { %v2714_v1 = vpop.f32.mrf.mxu1 }
 0x91f   :  { %v1126_v56 = vpop.xlane.xlu0 %1125 }
 0x920   :  { %v1128_v57 = vsub.f32 %v1118_v53, %v1126_v56 }
 0x922   :  { %v1131_v58 = vmul.f32 1.442695, %v1128_v57 }
 0x923   :  { %v2705_v60 = vpop.f32.mrf.mxu2 }
 0x924   :  { %2127 = vpow2.f32 %v1131_v58 }
 0x928   :  { %v2716_v4 = vpop.f32.mrf.mxu1 }
 0x92a   :  { %v2128_v59 = vpop.eup %2127 }
 0x92b   :  { %1920 = vmatmul.msk.f32.vlgmr.msrb.gmra.mxu0 %vm974_vm10, %v2128_v59  ;;  %v1136_v20 = vsel %vm974_vm10, %v2128_v59, 0.0 }
 0x930   :  { %v2718_v5 = vpop.f32.mrf.mxu1 }
 0x932   :  { %v1412_v61 = vpop.permute.xlu0 %1411 }
 0x933   :  { %1928 = vmatmul.msk.f32.vlgmr.msra.gmra.mxu0 %vm161_vm1, %v1276_v9  ;;  %1934 = vmatmul.msk.f32.vlgmr.msrb.gmra.mxu1 %vm161_vm1, %v1412_v61 }
 0x937   :  { %v1472_v62 = vpop.f32.mrf.mxu2 }
 0x938   :  { %v1478_v63 = vsel %vm974_vm10, %v1472_v62, -inf }
 0x939   :  { %1479 = vmax.xlane.f32.xlu0 %v1478_v63 }
 0x94d   :  { %2060 = vrot.lane.b32.xlu0 %v2059_v36, %s2324_s7 }
 0x977   :  { %1320 = vadd.xlane.f32.xlu0 %v1319_v0 }
 0x9a8   :  { %v2720_v6 = vpop.f32.mrf.mxu0 }
 0x9ac   :  { %v1480_v8 = vpop.xlane.xlu0 %1479 }
 0x9ad   :  { %v1482_v10 = vsub.f32 %v1472_v62, %v1480_v8 }
 0x9af   :  { %v1485_v11 = vmul.f32 1.442695, %v1482_v10 }
 0x9b0   :  { %v1304_v12 = vpop.f32.mrf.mxu0  ;;  %v1440_v13 = vpop.f32.mrf.mxu1 }
 0x9b1   :  { %2129 = vpow2.f32 %v1485_v11  ;;  %v1310_v31 = vsel %vm974_vm10, %v1304_v12, -inf  ;;  %v1475_v35 = vsel %vm974_vm10, %v1440_v13, -inf }
 0x9b2   :  { %1311 = vmax.xlane.f32.xlu1 %v1310_v31  ;;  %1476 = vmax.xlane.f32.xlu2 %v1475_v35 }
 0x9b7   :  { %v2130_v14 = vpop.eup %2129 }
 0x9b8   :  { %v1490_v15 = vsel %vm974_vm10, %v2130_v14, 0.0 }
 0x9b9   :  { %1491 = vadd.xlane.f32.xlu0 %v1490_v15 }
 0x9bf   :  { %v2061_v3 = vpop.permute.xlu0 %2060 }
 0x9c0   :  { %v2063_v37 = vunpack.i.h.bf16 %v2061_v3  ;;  %v2062_v38 = vunpack.i.l.bf16 %v2061_v3 }
 0x9ca   :  { %2050 = vrot.lane.b32.xlu2 %v2642_v39, %s2322_s27  ;;  %s1834_s27 = sshll.u32 %s2836_s10, 4  ;;  %s1835_s27 = int_to_ptr.hbm [resolvable:$true] %s1834_s27 }
 0x9cb   :  { %2055 = vrot.lane.b32.xlu1 %v2054_v17, %s2324_s7  ;;  %s2331_s7 = smov 8  }
 0x9ea   :  { %v1321_v53 = vpop.xlane.xlu0 %1320 }
 0x9f3   :  { %1134 = vadd.xlane.f32.xlu2 %v1133_v19 }
 0x9f5   :  { %1137 = vadd.xlane.f32.xlu1 %v1136_v20 }
 0xa25   :  { %v1312_v21 = vpop.xlane.xlu1 %1311  ;;  %v1477_v22 = vpop.xlane.xlu2 %1476 }
 0xa26   :  { %v1314_v23 = vsub.f32 %v1304_v12, %v1312_v21  ;;  %v1481_v24 = vsub.f32 %v1440_v13, %v1477_v22 }
 0xa28   :  { %v1317_v25 = vmul.f32 1.442695, %v1314_v23  ;;  %v1483_v28 = vmul.f32 1.442695, %v1481_v24 }
 0xa2a   :  { %2131 = vpow2.f32 %v1317_v25 }
 0xa2b   :  { %2133 = vpow2.f32 %v1483_v28 }
 0xa2c   :  { %v1492_v62 = vpop.xlane.xlu0 %1491 }
 0xa2d   :  { %v2051_v32 = vpop.permute.xlu2 %2050 }
 0xa2e   :  { %v2052_v34 = vunpack.i.l.bf16 %v2051_v32  ;;  %v2053_v29 = vunpack.i.h.bf16 %v2051_v32 }
 0xa30   :  { %v2132_v39 = vpop.eup %2131  ;;  %1377 = vmatpush.msrb.mxu0 %v2052_v34 }
 0xa31   :  { %v2134_v30 = vpop.eup %2133  ;;  %v1322_v16 = vsel %vm974_vm10, %v2132_v39, 0.0 }
 0xa32   :  { %1323 = vadd.xlane.f32.xlu2 %v1322_v16  ;;  %v1487_v2 = vsel %vm974_vm10, %v2134_v30, 0.0  ;;  %1378 = vmatpush.msrb.mxu0 %v2053_v29 }
 0xa33   :  { %1488 = vadd.xlane.f32.xlu1 %v1487_v2  ;;  %1930 = vmatmul.msk.f32.vlgmr.msrb.gmra.mxu0 %vm974_vm10, %v2132_v39 }
 0xa3d   :  { %v2056_v33 = vpop.permute.xlu1 %2055 }
 0xa3e   :  { %v2058_v7 = vunpack.i.h.bf16 %v2056_v33  ;;  %v2057_v9 = vunpack.i.l.bf16 %v2056_v33 }
 0xa40   :  { %1516 = vmatpush.msra.mxu0 %v2057_v9  ;;  %1545 = vmatpush.msra.mxu1 %v2058_v7 }
 0xa42   :  { %1517 = vmatpush.msra.mxu0 %v2062_v38  ;;  %1546 = vmatpush.msra.mxu1 %v2063_v37  ;;  %v1989_v37 = vld [vmem:[#allocation10 + $0x8] sm:$0xff] }
 0xa43   :  { %1938 = vmatmul.msk.f32.vlgmr.msra.gmra.mxu0 %vm974_vm10, %v2134_v30  ;;  %1939 = vmatmul.msk.f32.vlgmr.msra.gmra.mxu1 %vm974_vm10, %v2130_v14  ;;  %v2070_v14 = vld [vmem:[%s2828_s2 + $0x4] ss:$0 sm:$0xff] }
 0xa44   :  { %1665 = vmatpush.bf16.msrb.mxu0 %v1989_v37  ;;  %v2074_v37 = vld [vmem:[%s2828_s2 + $0x6] ss:$0 sm:$0xff] }
 0xa48   :  { %1666 = vmatpush.bf16.msrb.mxu0 %v1988_v40 }
 0xa66   :  { %v1135_v42 = vpop.xlane.xlu2 %1134 }
 0xa67   :  { %2135 = vrcp.f32 %v1135_v42 }
 0xa68   :  { %v1138_v43 = vpop.xlane.xlu1 %1137 }
 0xa69   :  { %2137 = vrcp.f32 %v1138_v43 }
 0xa6a   :  { %2139 = vrcp.f32 %v1321_v53 }
 0xa6d   :  { %v2136_v44 = vpop.eup %2135 }
 0xa6e   :  { %v1199_v46 = vmul.f32 %v2136_v44, %v2714_v1 }
 0xa6f   :  { %v2138_v45 = vpop.eup %2137 }
 0xa70   :  { %v1200_v47 = vmul.f32 %v2138_v45, %v2720_v6  ;;  %v2140_v55 = vpop.eup %2139 }
 0xa71   :  { %v1385_v58 = vmul.f32 %v2140_v55, %v2705_v60  ;;  %v2071_v55 = vld [vmem:[%s2828_s2 + $0x9] ss:$0 sm:$0xff] }
 0xa72   :  { %v1201_v48 = vpack.c.bf16 %v1200_v47, %v1199_v46 }
 0xa74   :  { %1921 = vmatmul.msk.bf16.vlgmr.msra.gmra.mxu3 %vm161_vm1, %v1201_v48 }
 0xaa5   :  { %v1324_v54 = vpop.xlane.xlu2 %1323 }
 0xaa6   :  { %2141 = vrcp.f32 %v1324_v54  ;;  %v1489_v63 = vpop.xlane.xlu1 %1488 }
 0xaa7   :  { %2143 = vrcp.f32 %v1492_v62 }
 0xaa8   :  { %2145 = vrcp.f32 %v1489_v63 }
 0xaac   :  { %v2142_v56 = vpop.eup %2141 }
 0xaad   :  { %v2144_v36 = vpop.eup %2143 }
 0xaae   :  { %v2146_v0 = vpop.eup %2145 }
 0xab0   :  { %v1380_v57 = vpop.f32.mrf.mxu0 }
 0xab1   :  { %v1386_v59 = vmul.f32 %v2142_v56, %v1380_v57 }
 0xab3   :  { %v1387_v61 = vpack.c.bf16 %v1386_v59, %v1385_v58  ;;  %v2072_v59 = vld [vmem:[%s2828_s2 + $0xa] ss:$0 sm:$0xff] }
 0xab5   :  { %1931 = vmatmul.msk.bf16.vlgmr.msrb.gmra.mxu3 %vm161_vm1, %v1387_v61 }
 0xac0   :  { %v1519_v1 = vpop.f32.mrf.mxu0  ;;  %v1548_v6 = vpop.f32.mrf.mxu1 }
 0xac1   :  { %v1553_v8 = vmul.f32 %v2146_v0, %v1519_v1  ;;  %v1554_v10 = vmul.f32 %v2144_v36, %v1548_v6 }
 0xac3   :  { %v1555_v11 = vpack.c.bf16 %v1554_v10, %v1553_v8 }
 0xac5   :  { %1940 = vmatmul.msk.bf16.vlgmr.msra.gmra.mxu2 %vm161_vm1, %v1555_v11  ;;  %v1997_v11 = vld [vmem:[%s2835_s9 + $0x38] sm:$0xff] }
 0xac6   :  { %1758 = vmatpush.bf16.msra.mxu3 %v1997_v11 }
 0xaf7   :  { %v1218_v12 = vpop.f32.mrf.mxu3 }
 0xaf8   :  { %v1239_v31 = vadd.f32 %v2716_v4, %v1218_v12  ;;  %v1996_v12 = vld [vmem:[%s2835_s9 + $0x30] sm:$0xff] }
 0xaf9   :  { %1759 = vmatpush.bf16.msra.mxu3 %v1996_v12 }
 0xaff   :  { %v1220_v13 = vpop.f32.mrf.mxu3 }
 0xb00   :  { %v1241_v21 = vadd.f32 %v2718_v5, %v1220_v13  ;;  %v1993_v13 = vld [vmem:[%s2835_s9 + $0x18] sm:$0xff] }
 0xb38   :  { %v1404_v60 = vpop.f32.mrf.mxu3 }
 0xb39   :  { %v1409_v35 = vadd.f32 %v1404_v60, %v1239_v31  ;;  %v1992_v60 = vld [vmem:[%s2835_s9 + $0x10] sm:$0xff]  ;;  %v1991_v31 = vld [vmem:[%s2835_s9 + $0x8] sm:$0xff] }
 0xb40   :  { %v1406_v20 = vpop.f32.mrf.mxu3 }
 0xb41   :  { %v1410_v23 = vadd.f32 %v1406_v20, %v1241_v21 }
 0xb48   :  { %v1572_v15 = vpop.f32.mrf.mxu2 }
 0xb49   :  { %v1577_v17 = vadd.f32 %v1572_v15, %v1409_v35  ;;  %v1990_v35 = vld [vmem:[%s2835_s9] sm:$0xff] }
 0xb4b   :  { %v1581_v19 = vadd.f32 %v2070_v14, %v1577_v17 }
 0xb4d   :  { %v1585_v22 = vsel %vm140_vm0, %v1581_v19, 0.0 }
 0xb4e   :  { %1586 = vadd.xlane.f32.xlu2 %v1585_v22 }
 0xb50   :  { %v1574_v24 = vpop.f32.mrf.mxu2 }
 0xb51   :  { %v1578_v25 = vadd.f32 %v1574_v24, %v1410_v23 }
 0xb53   :  { %v1582_v28 = vadd.f32 %v2070_v14, %v1578_v25  ;;  %v2073_v14 = vld [vmem:[%s2828_s2 + $0x5] ss:$0 sm:$0xff] }
 0xb55   :  { %v1588_v4 = vsel %vm140_vm0, %v1582_v28, 0.0 }
 0xb56   :  { %1589 = vadd.xlane.f32.xlu1 %v1588_v4 }
 0xbc1   :  { %v1587_v32 = vpop.xlane.xlu2 %1586 }
 0xbc2   :  { %v1591_v34 = vmul.f32 %v1587_v32, %v2551_v18 }
 0xbc4   :  { %v1593_v39 = vsub.f32 %v1581_v19, %v1591_v34 }
 0xbc6   :  { %v1595_v29 = vmul.f32 %v1593_v39, %v1593_v39 }
 0xbc8   :  { %v1597_v30 = vsel %vm140_vm0, %v1595_v29, 0.0 }
 0xbc9   :  { %1598 = vadd.xlane.f32.xlu0 %v1597_v30  ;;  %v1590_v16 = vpop.xlane.xlu1 %1589 }
 0xbca   :  { %v1592_v5 = vmul.f32 %v1590_v16, %v2551_v18 }
 0xbcc   :  { %v1594_v2 = vsub.f32 %v1582_v28, %v1592_v5 }
 0xbce   :  { %v1596_v3 = vmul.f32 %v1594_v2, %v1594_v2 }
 0xbd0   :  { %v1600_v33 = vsel %vm140_vm0, %v1596_v3, 0.0 }
 0xbd1   :  { %1601 = vadd.xlane.f32.xlu2 %v1600_v33 }
 0xc3c   :  { %v1599_v7 = vpop.xlane.xlu0 %1598 }
 0xc3d   :  { %v1603_v9 = vmul.f32 %v1599_v7, %v2551_v18 }
 0xc3f   :  { %v1605_v38 = vadd.f32 1e-05, %v1603_v9 }
 0xc41   :  { %2147 = vrsqrt.f32 %v1605_v38  ;;  %vm1613_vm12 = vweird.f32 %v1605_v38 }
 0xc44   :  { %v1602_v41 = vpop.xlane.xlu2 %1601 }
 0xc45   :  { %v1604_v42 = vmul.f32 %v1602_v41, %v2551_v18 }
 0xc47   :  { %v2148_v43 = vpop.eup %2147  ;;  %v1606_v44 = vadd.f32 1e-05, %v1604_v42 }
 0xc48   :  { %v1608_v45 = vmul.f32 %v2148_v43, %v1605_v38  ;;  %vm1614_vm11 = vweird.f32 %v2148_v43 }
 0xc49   :  { %2149 = vrsqrt.f32 %v1606_v44  ;;  %vm1615_vm13 = vmor %vm1613_vm12, %vm1614_vm11  ;;  %vm1623_vm15 = vweird.f32 %v1606_v44 }
 0xc4a   :  { %v1609_v46 = vmul.f32 %v2148_v43, %v1608_v45 }
 0xc4c   :  { %v1610_v47 = vmul.f32 0.5, %v1609_v46 }
 0xc4e   :  { %v1611_v48 = vsub.f32 1.5, %v1610_v47 }
 0xc4f   :  { %v2150_v49 = vpop.eup %2149 }
 0xc50   :  { %v1612_v50 = vmul.f32 %v2148_v43, %v1611_v48  ;;  %v1618_v51 = vmul.f32 %v2150_v49, %v1606_v44  ;;  %vm1624_vm14 = vweird.f32 %v2150_v49 }
 0xc51   :  { %vm1625_vm1 = vmor %vm1623_vm15, %vm1624_vm14 }
 0xc52   :  { %v1616_v52 = vsel %vm1615_vm13, %v2148_v43, %v1612_v50  ;;  %v1619_v53 = vmul.f32 %v2150_v49, %v1618_v51 }
 0xc53   :  { %v1627_v56 = vmul.f32 %v1616_v52, %v1593_v39 }
 0xc54   :  { %v1620_v54 = vmul.f32 0.5, %v1619_v53 }
 0xc55   :  { %v1630_v61 = vmul.f32 %v2071_v55, %v1627_v56 }
 0xc56   :  { %v1621_v57 = vsub.f32 1.5, %v1620_v54 }
 0xc57   :  { %v1633_v36 = vadd.f32 %v2072_v59, %v1630_v61 }
 0xc58   :  { %v1622_v58 = vmul.f32 %v2150_v49, %v1621_v57 }
 0xc59   :  { %v2767_v6 = vadd.f32 %v1633_v36, %v2580_v26  ;;  %v1995_v26 = vld [vmem:[%s2835_s9 + $0x28] sm:$0xff] }
 0xc5a   :  { %v1626_v62 = vsel %vm1625_vm1, %v2150_v49, %v1622_v58  ;;  %1760 = vmatpush.bf16.msra.mxu3 %v1995_v26  ;;  %v2075_v26 = vld [vmem:[%s2828_s2 + $0xb] ss:$0 sm:$0xff] }
 0xc5b   :  { %v1628_v63 = vmul.f32 %v1626_v62, %v1594_v2 }
 0xc5d   :  { %v1631_v0 = vmul.f32 %v2071_v55, %v1628_v63 }
 0xc5f   :  { %v1634_v1 = vadd.f32 %v2072_v59, %v1631_v0 }
 0xc61   :  { %v2770_v8 = vadd.f32 %v1634_v1, %v2583_v27  ;;  %v1994_v27 = vld [vmem:[%s2835_s9 + $0x20] sm:$0xff] }
 0xc62   :  { %1761 = vmatpush.bf16.msra.mxu3 %v1994_v27 }
 0xc63   :  { %v1637_v10 = vpack.c.bf16 %v2770_v8, %v2767_v6 }
 0xc65   :  { %1949 = vmatmul.msk.bf16.vlgmr.msrb.gmra.mxu0 %vm140_vm0, %v1637_v10 }
 0xc66   :  { %1762 = vmatpush.bf16.msra.mxu3 %v1993_v13 }
 0xc6a   :  { %1763 = vmatpush.bf16.msra.mxu3 %v1992_v60 }
 0xc6e   :  { %1764 = vmatpush.bf16.msra.mxu3 %v1991_v31 }
 0xc72   :  { %1765 = vmatpush.bf16.msra.mxu3 %v1990_v35 }
 0xce2   :  { %v1668_v15 = vpop.f32.mrf.mxu0 }
 0xce3   :  { %v1669_v17 = vadd.f32 %v2073_v14, %v1668_v15 }
 0xce5   :  { %v1675_v19 = vmul.f32 0.044715, %v1669_v17  ;;  %v1673_v5 = vmul.f32 0.5, %v1669_v17 }
 0xce7   :  { %v1677_v20 = vmul.f32 %v1675_v19, %v1669_v17 }
 0xce9   :  { %v1679_v21 = vmul.f32 %v1677_v20, %v1669_v17 }
 0xcea   :  { %v1670_v22 = vpop.f32.mrf.mxu0 }
 0xceb   :  { %v1681_v23 = vadd.f32 %v1679_v21, %v1669_v17  ;;  %v1671_v24 = vadd.f32 %v2073_v14, %v1670_v22 }
 0xced   :  { %v1676_v25 = vmul.f32 0.044715, %v1671_v24  ;;  %v1683_v28 = vmul.f32 0.7978846, %v1681_v23  ;;  %v1674_v2 = vmul.f32 0.5, %v1671_v24 }
 0xcef   :  { %v1678_v4 = vmul.f32 %v1676_v25, %v1671_v24  ;;  %2151 = vtanh.f32 %v1683_v28 }
 0xcf1   :  { %v1680_v32 = vmul.f32 %v1678_v4, %v1671_v24 }
 0xcf3   :  { %v1682_v34 = vadd.f32 %v1680_v32, %v1671_v24 }
 0xcf5   :  { %v1684_v39 = vmul.f32 0.7978846, %v1682_v34  ;;  %v2152_v29 = vpop.eup %2151 }
 0xcf6   :  { %v1687_v30 = vadd.f32 1.0, %v2152_v29 }
 0xcf7   :  { %2153 = vtanh.f32 %v1684_v39 }
 0xcf8   :  { %v1689_v33 = vmul.f32 %v1687_v30, %v1673_v5 }
 0xcfd   :  { %v2154_v16 = vpop.eup %2153 }
 0xcfe   :  { %v1688_v3 = vadd.f32 1.0, %v2154_v16 }
 0xd00   :  { %v1690_v7 = vmul.f32 %v1688_v3, %v1674_v2 }
 0xd02   :  { %v1691_v9 = vpack.c.bf16 %v1690_v7, %v1689_v33 }
 0xd04   :  { %1766 = vmatmul.bf16.vlgmr.msra.gmra.mxu3 %v1691_v9 }
 0xd87   :  { %v1767_v38 = vpop.f32.mrf.mxu3 }
 0xd88   :  { %v1768_v40 = vadd.f32 %v2074_v37, %v1767_v38 }
 0xd8a   :  { %v1774_v41 = vsel %vm140_vm0, %v1768_v40, 0.0 }
 0xd8b   :  { %1775 = vadd.xlane.f32.xlu1 %v1774_v41 }
 0xd8f   :  { %v1769_v42 = vpop.f32.mrf.mxu3 }
 0xd90   :  { %v1770_v43 = vadd.f32 %v2074_v37, %v1769_v42 }
 0xd92   :  { %v1777_v44 = vsel %vm140_vm0, %v1770_v43, 0.0 }
 0xd93   :  { %1778 = vadd.xlane.f32.xlu0 %v1777_v44 }
 0xdfe   :  { %v1776_v45 = vpop.xlane.xlu1 %1775 }
 0xdff   :  { %v1780_v46 = vmul.f32 %v1776_v45, %v2551_v18 }
 0xe01   :  { %v1782_v47 = vsub.f32 %v1768_v40, %v1780_v46 }
 0xe03   :  { %v1784_v48 = vmul.f32 %v1782_v47, %v1782_v47 }
 0xe05   :  { %v1786_v49 = vsel %vm140_vm0, %v1784_v48, 0.0 }
 0xe06   :  { %v1779_v50 = vpop.xlane.xlu0 %1778  ;;  %1787 = vadd.xlane.f32.xlu2 %v1786_v49 }
 0xe07   :  { %v1781_v51 = vmul.f32 %v1779_v50, %v2551_v18 }
 0xe09   :  { %v1783_v52 = vsub.f32 %v1770_v43, %v1781_v51 }
 0xe0b   :  { %v1785_v53 = vmul.f32 %v1783_v52, %v1783_v52 }
 0xe0d   :  { %v1789_v54 = vsel %vm140_vm0, %v1785_v53, 0.0 }
 0xe0e   :  { %1790 = vadd.xlane.f32.xlu1 %v1789_v54 }
 0xe79   :  { %v1788_v55 = vpop.xlane.xlu2 %1787 }
 0xe7a   :  { %v1792_v56 = vmul.f32 %v1788_v55, %v2551_v18 }
 0xe7c   :  { %v1794_v57 = vadd.f32 1e-05, %v1792_v56 }
 0xe7e   :  { %2155 = vrsqrt.f32 %v1794_v57  ;;  %vm1802_vm3 = vweird.f32 %v1794_v57 }
 0xe81   :  { %v1791_v58 = vpop.xlane.xlu1 %1790 }
 0xe82   :  { %v1793_v59 = vmul.f32 %v1791_v58, %v2551_v18  ;;  %v2076_v18 = vld [vmem:[%s2828_s2 + $0xc] ss:$0 sm:$0xff] }
 0xe84   :  { %v2156_v61 = vpop.eup %2155  ;;  %v1795_v62 = vadd.f32 1e-05, %v1793_v59 }
 0xe85   :  { %v1797_v63 = vmul.f32 %v2156_v61, %v1794_v57  ;;  %vm1803_vm2 = vweird.f32 %v2156_v61 }
 0xe86   :  { %2157 = vrsqrt.f32 %v1795_v62  ;;  %vm1804_vm4 = vmor %vm1802_vm3, %vm1803_vm2  ;;  %vm1812_vm6 = vweird.f32 %v1795_v62 }
 0xe87   :  { %v1798_v36 = vmul.f32 %v2156_v61, %v1797_v63 }
 0xe89   :  { %v1799_v0 = vmul.f32 0.5, %v1798_v36 }
 0xe8b   :  { %v1800_v1 = vsub.f32 1.5, %v1799_v0 }
 0xe8c   :  { %v2158_v10 = vpop.eup %2157 }
 0xe8d   :  { %v1801_v11 = vmul.f32 %v2156_v61, %v1800_v1  ;;  %v1807_v12 = vmul.f32 %v2158_v10, %v1795_v62  ;;  %vm1813_vm5 = vweird.f32 %v2158_v10 }
 0xe8e   :  { %vm1814_vm7 = vmor %vm1812_vm6, %vm1813_vm5 }
 0xe8f   :  { %v1805_v27 = vsel %vm1804_vm4, %v2156_v61, %v1801_v11  ;;  %v1808_v13 = vmul.f32 %v2158_v10, %v1807_v12 }
 0xe90   :  { %v1816_v60 = vmul.f32 %v1805_v27, %v1782_v47 }
 0xe91   :  { %v1809_v31 = vmul.f32 0.5, %v1808_v13 }
 0xe92   :  { %v1819_v35 = vmul.f32 %v2075_v26, %v1816_v60 }
 0xe93   :  { %v1810_v14 = vsub.f32 1.5, %v1809_v31 }
 0xe94   :  { %v1822_v15 = vadd.f32 %v2076_v18, %v1819_v35 }
 0xe95   :  { %v1811_v17 = vmul.f32 %v2158_v10, %v1810_v14 }
 0xe96   :  { %v1824_v19 = vadd.f32 %v1822_v15, %v2767_v6 }
 0xe97   :  { %v1815_v20 = vsel %vm1814_vm7, %v2158_v10, %v1811_v17 }
 0xe98   :  { %1826 = vst.msk [vmem:[#allocation11] sm:$0xff] %vm140_vm0, %v1824_v19  ;;  %v1817_v21 = vmul.f32 %v1815_v20, %v1783_v52 }
 0xe9a   :  { %v1820_v22 = vmul.f32 %v2075_v26, %v1817_v21 }
 0xe9c   :  { %v1823_v23 = vadd.f32 %v2076_v18, %v1820_v22 }
 0xe9e   :  { %v1825_v24 = vadd.f32 %v1823_v23, %v2770_v8 }
 0xea0   :  { %1827 = vst.msk [vmem:[#allocation11 + $0x8] sm:$0xff] %vm140_vm0, %v1825_v24 }
 0xea1   :  { %1840 = dma.vmem_to_hbm [thread:$0]  %s1833_s26, 256, %s1835_s27, [#allocation4], %s2330_s28, %s2330_s28, %s2331_s7  }
 0xea2   :  { %2309 = dma.done.wait [#allocation4], 256  }
 0xea3   :  { %2310 = vsyncadd [#allocation4], 4294967040 }
 0xea4   :  { %1845 = vsyncpa [#allocation3], 1 }
 0xea5   :  { %1846 = vsyncpa [#allocation6], 1 }
 0xea6   :  { %1847 = vsyncpa [#allocation9], 1 }
 0xea7   :  { %1848 = vsyncpa [#allocation4], 1 }

</bundles_post_ra>
